<compile_context>
chip_gen: v5e
topology: v5e:2x2
jax: 0.10.0
libtpu: 0.0.40
codegen_flags: <defaults>
</compile_context>

<pallas_src>
import math

import jax
import jax.numpy as jnp
from jax.experimental import pallas as pl
from jax.experimental.pallas import tpu as pltpu


LANES = 128          # lane-dense padded output width
ROW_TILE = 1024      # row tile target (multiple of 8); fits default scoped VMEM

_CPARAMS = pltpu.CompilerParams(dimension_semantics=("parallel",))


# ----------------------------- Pallas kernels ------------------------------

def _conv_pool_kernel(x00_ref, x01_ref, x10_ref, x11_ref, w_ref, b_ref, o_ref):
    # Fused conv (as im2col matmul) + 2x2 max-pool + bias + ReLU.
    # x_p: (TN, K) bf16, one row per *pooled* output position, p = pool-window
    # element.  w: (K, 128) bf16 (Cout zero-padded to 128).  b: (1, 128) f32.
    w = w_ref[...]
    z = jnp.dot(x00_ref[...], w, preferred_element_type=jnp.float32)
    z = jnp.maximum(z, jnp.dot(x01_ref[...], w, preferred_element_type=jnp.float32))
    z = jnp.maximum(z, jnp.dot(x10_ref[...], w, preferred_element_type=jnp.float32))
    z = jnp.maximum(z, jnp.dot(x11_ref[...], w, preferred_element_type=jnp.float32))
    z = jnp.maximum(z + b_ref[...], 0.0)          # relu(max_p(.) + b) == pool(relu(.+b))
    o_ref[...] = z.astype(o_ref.dtype)


def _mlp_kernel(x_ref, w1_ref, b1_ref, w2_ref, b2_ref, w3_ref, b3_ref, o_ref):
    # fc1 -> relu -> fc2 -> relu -> fc3 (Linear_IFA forward == plain linear).
    # All weights (., 128) bf16 with zero padding; biases (1, 128) f32.
    h = jnp.dot(x_ref[...], w1_ref[...], preferred_element_type=jnp.float32)
    h = jnp.maximum(h + b1_ref[...], 0.0).astype(jnp.bfloat16)
    h = jnp.dot(h, w2_ref[...], preferred_element_type=jnp.float32)
    h = jnp.maximum(h + b2_ref[...], 0.0).astype(jnp.bfloat16)
    o = jnp.dot(h, w3_ref[...], preferred_element_type=jnp.float32) + b3_ref[...]
    o_ref[...] = o.astype(o_ref.dtype)


# ----------------------------- kernel wrappers ------------------------------

def _tile_rows(n):
    # Full array if it fits a tile (block == full dim is always legal);
    # otherwise a fixed multiple-of-8 tile with boundary masking by Pallas.
    return n if n <= ROW_TILE else ROW_TILE


def conv_pool(x_parts, w, b):
    # x_parts: 4 arrays (N, K) bf16; w: (K, 128) bf16; b: (1, 128) f32.
    n, k = x_parts[0].shape
    tn = _tile_rows(n)
    xspec = pl.BlockSpec((tn, k), lambda i: (i, 0))
    return pl.pallas_call(
        _conv_pool_kernel,
        out_shape=jax.ShapeDtypeStruct((n, LANES), jnp.bfloat16),
        grid=(pl.cdiv(n, tn),),
        in_specs=[xspec, xspec, xspec, xspec,
                  pl.BlockSpec((k, LANES), lambda i: (0, 0)),
                  pl.BlockSpec((1, LANES), lambda i: (0, 0))],
        out_specs=pl.BlockSpec((tn, LANES), lambda i: (i, 0)),
        compiler_params=_CPARAMS,
    )(*x_parts, w, b)


def mlp(x, w1, b1, w2, b2, w3, b3):
    n, k = x.shape
    tn = _tile_rows(n)
    return pl.pallas_call(
        _mlp_kernel,
        out_shape=jax.ShapeDtypeStruct((n, LANES), jnp.float32),
        grid=(pl.cdiv(n, tn),),
        in_specs=[
            pl.BlockSpec((tn, k), lambda i: (i, 0)),
            pl.BlockSpec(w1.shape, lambda i: (0, 0)),
            pl.BlockSpec(b1.shape, lambda i: (0, 0)),
            pl.BlockSpec(w2.shape, lambda i: (0, 0)),
            pl.BlockSpec(b2.shape, lambda i: (0, 0)),
            pl.BlockSpec(w3.shape, lambda i: (0, 0)),
            pl.BlockSpec(b3.shape, lambda i: (0, 0)),
        ],
        out_specs=pl.BlockSpec((tn, LANES), lambda i: (i, 0)),
        compiler_params=_CPARAMS,
    )(x, w1, b1, w2, b2, w3, b3)


# ------------------------------- JAX glue -----------------------------------

def im2col_pool_split(x, kh, kw):
    # x: (B, H, W, C) -> 4 matrices, each (B*PH*PW, kh*kw*C), one per element
    # (dy, dx) of the 2x2 pool window; row r = (b, ph, pw) holds the im2col
    # patch at conv-output position (2*ph+dy, 2*pw+dx).  Column order (i,j,c)
    # matches the (KH,KW,Cin,Cout) -> (KH*KW*Cin, Cout) weight reshape.
    B, H, W, C = x.shape
    Ho, Wo = H - kh + 1, W - kw + 1
    PH, PW = Ho // 2, Wo // 2
    cols = jnp.concatenate(
        [x[:, i:i + Ho, j:j + Wo, :] for i in range(kh) for j in range(kw)],
        axis=-1)                                            # (B, Ho, Wo, K)
    parts = []
    for dy in range(2):
        for dx in range(2):
            sub = cols[:, dy::2, dx::2, :]                  # (B, PH, PW, K)
            parts.append(sub.reshape(B * PH * PW, kh * kw * C))
    return parts


def init_params(key):
    # PyTorch-style init U(-1/sqrt(fan_in), 1/sqrt(fan_in)), then:
    #  - conv weights reshaped to (KH*KW*Cin, Cout), fc1 rows in NHWC order,
    #  - all output dims zero-padded to 128 lanes, weights cast to bf16,
    #  - biases kept f32 as (1, 128).
    keys = jax.random.split(key, 10)

    def u(k, shape, fan_in):
        bound = 1.0 / math.sqrt(fan_in)
        return jax.random.uniform(k, shape, jnp.float32, -bound, bound)

    def pad_w(w, rows=None):
        r = w.shape[0] if rows is None else rows
        w = jnp.pad(w, ((0, r - w.shape[0]), (0, LANES - w.shape[1])))
        return w.astype(jnp.bfloat16)

    def pad_b(b):
        return jnp.pad(b, (0, LANES - b.shape[0])).reshape(1, LANES)

    w_conv1 = u(keys[0], (5, 5, 3, 6), 3 * 25).reshape(75, 6)
    w_conv2 = u(keys[2], (5, 5, 6, 16), 6 * 25).reshape(150, 16)
    w_fc1 = u(keys[4], (400, 120), 400)      # rows in NHWC (h, w, c) flatten order
    w_fc2 = u(keys[6], (120, 84), 120)
    w_fc3 = u(keys[8], (84, 10), 84)

    return {
        "w_conv1": pad_w(w_conv1),                     # (75, 128) bf16
        "b_conv1": pad_b(u(keys[1], (6,), 3 * 25)),    # (1, 128) f32
        "w_conv2": pad_w(w_conv2),                     # (150, 128) bf16
        "b_conv2": pad_b(u(keys[3], (16,), 6 * 25)),
        "w_fc1": pad_w(w_fc1),                         # (400, 128) bf16
        "b_fc1": pad_b(u(keys[5], (120,), 400)),
        "w_fc2": pad_w(w_fc2, rows=LANES),             # (128, 128) bf16
        "b_fc2": pad_b(u(keys[7], (84,), 120)),
        "w_fc3": pad_w(w_fc3, rows=LANES),             # (128, 128) bf16
        "b_fc3": pad_b(u(keys[9], (10,), 84)),
    }


def lenet_dfa_forward(params, x_nchw):
    x = jnp.transpose(x_nchw, (0, 2, 3, 1)).astype(jnp.bfloat16)   # NCHW -> NHWC
    B = x.shape[0]

    # conv1 (3->6, k=5) + relu + 2x2 max-pool, fused in one Pallas call.
    parts = im2col_pool_split(x, 5, 5)                             # 4 x (B*196, 75)
    y = conv_pool(parts, params["w_conv1"], params["b_conv1"])     # (B*196, 128) bf16
    y = y[:, :6].reshape(B, 14, 14, 6)
    # conv1_fb (Feedback_Reciever): identity in forward.

    # conv2 (6->16, k=5) + relu + 2x2 max-pool, fused.
    parts = im2col_pool_split(y, 5, 5)                             # 4 x (B*25, 150)
    y = conv_pool(parts, params["w_conv2"], params["b_conv2"])     # (B*25, 128) bf16
    # conv2_fb: identity in forward.

    # Flatten in NHWC order (w_fc1 rows are permuted to match at init).
    flat = y[:, :16].reshape(B, 400)

    # fc1 -> relu -> fc2 -> relu -> fc3 (Linear_IFA) as one fused Pallas call.
    out = mlp(flat, params["w_fc1"], params["b_fc1"],
              params["w_fc2"], params["b_fc2"],
              params["w_fc3"], params["b_fc3"])                    # (B, 128) f32
    return out[:, :10]


if __name__ == "__main__":
    key = jax.random.PRNGKey(0)
    pkey, xkey = jax.random.split(key)
    params = init_params(pkey)
    # LeNet geometry (16*5*5 = 400 flatten) implies 3x32x32 inputs.
    x = jax.random.normal(xkey, (2, 3, 32, 32), jnp.float32)

    out = jax.jit(lenet_dfa_forward)(params, x)
    out = jax.block_until_ready(out)
    assert out.shape == (2, 10) and out.dtype == jnp.float32
    assert bool(jnp.all(jnp.isfinite(out)))
    print("KERNEL_OK")
</pallas_src>

<mosaic_0001>
module attributes {stable_mosaic.version = 11 : i64} {
  func.func @_conv_pool_kernel(%arg0: i32, %arg1: memref<392x75xbf16, #tpu.memory_space<vmem>>, %arg2: memref<392x75xbf16, #tpu.memory_space<vmem>>, %arg3: memref<392x75xbf16, #tpu.memory_space<vmem>>, %arg4: memref<392x75xbf16, #tpu.memory_space<vmem>>, %arg5: memref<75x128xbf16, #tpu.memory_space<vmem>>, %arg6: memref<1x128xf32, #tpu.memory_space<vmem>>, %arg7: memref<392x128xbf16, #tpu.memory_space<vmem>>) attributes {dimension_semantics = [#tpu.dimension_semantics<parallel>], iteration_bounds = array<i64: 1>, scalar_prefetch = 0 : i64, scratch_operands = 0 : i64, tpu.core_type = #tpu.core_type<tc>, window_params = [{transform_indices = @transform_0, window_bounds = array<i64: 392, 75>}, {transform_indices = @transform_1, window_bounds = array<i64: 392, 75>}, {transform_indices = @transform_2, window_bounds = array<i64: 392, 75>}, {transform_indices = @transform_3, window_bounds = array<i64: 392, 75>}, {pipeline_mode = #tpu.pipeline_mode<synchronous>, transform_indices = @transform_4, window_bounds = array<i64: 75, 128>}, {pipeline_mode = #tpu.pipeline_mode<synchronous>, transform_indices = @transform_5, window_bounds = array<i64: 1, 128>}, {transform_indices = @transform_6, window_bounds = array<i64: 392, 128>}]} {
    %c0 = arith.constant 0 : index
    %c0_0 = arith.constant 0 : index
    %0 = vector.load %arg5[%c0, %c0_0] : memref<75x128xbf16, #tpu.memory_space<vmem>>, vector<75x128xbf16>
    %c0_1 = arith.constant 0 : index
    %c0_2 = arith.constant 0 : index
    %1 = vector.load %arg1[%c0_1, %c0_2] : memref<392x75xbf16, #tpu.memory_space<vmem>>, vector<392x75xbf16>
    %cst = arith.constant dense<0.000000e+00> : vector<392x128xf32>
    %2 = tpu.matmul %1, %0, %cst {dimension_numbers = #tpu.dot_dimension_numbers<[1], [0], [0], [1], [0, 0, 1, 1], [], []>} : vector<392x75xbf16>, vector<75x128xbf16>, vector<392x128xf32> -> vector<392x128xf32>
    %c0_3 = arith.constant 0 : index
    %c0_4 = arith.constant 0 : index
    %3 = vector.load %arg2[%c0_3, %c0_4] : memref<392x75xbf16, #tpu.memory_space<vmem>>, vector<392x75xbf16>
    %cst_5 = arith.constant dense<0.000000e+00> : vector<392x128xf32>
    %4 = tpu.matmul %3, %0, %cst_5 {dimension_numbers = #tpu.dot_dimension_numbers<[1], [0], [0], [1], [0, 0, 1, 1], [], []>} : vector<392x75xbf16>, vector<75x128xbf16>, vector<392x128xf32> -> vector<392x128xf32>
    %5 = arith.maximumf %2, %4 : vector<392x128xf32>
    %c0_6 = arith.constant 0 : index
    %c0_7 = arith.constant 0 : index
    %6 = vector.load %arg3[%c0_6, %c0_7] : memref<392x75xbf16, #tpu.memory_space<vmem>>, vector<392x75xbf16>
    %cst_8 = arith.constant dense<0.000000e+00> : vector<392x128xf32>
    %7 = tpu.matmul %6, %0, %cst_8 {dimension_numbers = #tpu.dot_dimension_numbers<[1], [0], [0], [1], [0, 0, 1, 1], [], []>} : vector<392x75xbf16>, vector<75x128xbf16>, vector<392x128xf32> -> vector<392x128xf32>
    %8 = arith.maximumf %5, %7 : vector<392x128xf32>
    %c0_9 = arith.constant 0 : index
    %c0_10 = arith.constant 0 : index
    %9 = vector.load %arg4[%c0_9, %c0_10] : memref<392x75xbf16, #tpu.memory_space<vmem>>, vector<392x75xbf16>
    %cst_11 = arith.constant dense<0.000000e+00> : vector<392x128xf32>
    %10 = tpu.matmul %9, %0, %cst_11 {dimension_numbers = #tpu.dot_dimension_numbers<[1], [0], [0], [1], [0, 0, 1, 1], [], []>} : vector<392x75xbf16>, vector<75x128xbf16>, vector<392x128xf32> -> vector<392x128xf32>
    %11 = arith.maximumf %8, %10 : vector<392x128xf32>
    %c0_12 = arith.constant 0 : index
    %c0_13 = arith.constant 0 : index
    %12 = vector.load %arg6[%c0_12, %c0_13] : memref<1x128xf32, #tpu.memory_space<vmem>>, vector<1x128xf32>
    %13 = vector.broadcast %12 : vector<1x128xf32> to vector<392x128xf32>
    %14 = arith.addf %11, %13 : vector<392x128xf32>
    %cst_14 = arith.constant 0.000000e+00 : f32
    %15 = vector.broadcast %cst_14 : f32 to vector<392x128xf32>
    %16 = arith.maximumf %14, %15 : vector<392x128xf32>
    %17 = arith.truncf %16 : vector<392x128xf32> to vector<392x128xbf16>
    %c0_15 = arith.constant 0 : index
    %c0_16 = arith.constant 0 : index
    %18 = vector.load %arg7[%c0_15, %c0_16] : memref<392x128xbf16, #tpu.memory_space<vmem>>, vector<392x128xbf16>
    tpu.vector_store %arg7[%c0_15, %c0_16], %17 {strides = array<i32>} : memref<392x128xbf16, #tpu.memory_space<vmem>>, vector<392x128xbf16>,
    return
  }
  func.func @transform_0(%arg0: i32) -> (i32, i32) {
    %c0_i32 = arith.constant 0 : i32
    %c0_i32_0 = arith.constant 0 : i32
    return %arg0, %c0_i32 : i32, i32
  }
  func.func @transform_1(%arg0: i32) -> (i32, i32) {
    %c0_i32 = arith.constant 0 : i32
    %c0_i32_0 = arith.constant 0 : i32
    return %arg0, %c0_i32 : i32, i32
  }
  func.func @transform_2(%arg0: i32) -> (i32, i32) {
    %c0_i32 = arith.constant 0 : i32
    %c0_i32_0 = arith.constant 0 : i32
    return %arg0, %c0_i32 : i32, i32
  }
  func.func @transform_3(%arg0: i32) -> (i32, i32) {
    %c0_i32 = arith.constant 0 : i32
    %c0_i32_0 = arith.constant 0 : i32
    return %arg0, %c0_i32 : i32, i32
  }
  func.func @transform_4(%arg0: i32) -> (i32, i32) {
    %c0_i32 = arith.constant 0 : i32
    %c0_i32_0 = arith.constant 0 : i32
    %c0_i32_1 = arith.constant 0 : i32
    return %c0_i32, %c0_i32_0 : i32, i32
  }
  func.func @transform_5(%arg0: i32) -> (i32, i32) {
    %c0_i32 = arith.constant 0 : i32
    %c0_i32_0 = arith.constant 0 : i32
    %c0_i32_1 = arith.constant 0 : i32
    return %c0_i32, %c0_i32_0 : i32, i32
  }
  func.func @transform_6(%arg0: i32) -> (i32, i32) {
    %c0_i32 = arith.constant 0 : i32
    %c0_i32_0 = arith.constant 0 : i32
    return %arg0, %c0_i32 : i32, i32
  }
}

module attributes {stable_mosaic.version = 11 : i64} {
  func.func @_conv_pool_kernel(%arg0: i32, %arg1: memref<50x150xbf16, #tpu.memory_space<vmem>>, %arg2: memref<50x150xbf16, #tpu.memory_space<vmem>>, %arg3: memref<50x150xbf16, #tpu.memory_space<vmem>>, %arg4: memref<50x150xbf16, #tpu.memory_space<vmem>>, %arg5: memref<150x128xbf16, #tpu.memory_space<vmem>>, %arg6: memref<1x128xf32, #tpu.memory_space<vmem>>, %arg7: memref<50x128xbf16, #tpu.memory_space<vmem>>) attributes {dimension_semantics = [#tpu.dimension_semantics<parallel>], iteration_bounds = array<i64: 1>, scalar_prefetch = 0 : i64, scratch_operands = 0 : i64, tpu.core_type = #tpu.core_type<tc>, window_params = [{transform_indices = @transform_0, window_bounds = array<i64: 50, 150>}, {transform_indices = @transform_1, window_bounds = array<i64: 50, 150>}, {transform_indices = @transform_2, window_bounds = array<i64: 50, 150>}, {transform_indices = @transform_3, window_bounds = array<i64: 50, 150>}, {pipeline_mode = #tpu.pipeline_mode<synchronous>, transform_indices = @transform_4, window_bounds = array<i64: 150, 128>}, {pipeline_mode = #tpu.pipeline_mode<synchronous>, transform_indices = @transform_5, window_bounds = array<i64: 1, 128>}, {transform_indices = @transform_6, window_bounds = array<i64: 50, 128>}]} {
    %c0 = arith.constant 0 : index
    %c0_0 = arith.constant 0 : index
    %0 = vector.load %arg5[%c0, %c0_0] : memref<150x128xbf16, #tpu.memory_space<vmem>>, vector<150x128xbf16>
    %c0_1 = arith.constant 0 : index
    %c0_2 = arith.constant 0 : index
    %1 = vector.load %arg1[%c0_1, %c0_2] : memref<50x150xbf16, #tpu.memory_space<vmem>>, vector<50x150xbf16>
    %cst = arith.constant dense<0.000000e+00> : vector<50x128xf32>
    %2 = tpu.matmul %1, %0, %cst {dimension_numbers = #tpu.dot_dimension_numbers<[1], [0], [0], [1], [0, 0, 1, 1], [], []>} : vector<50x150xbf16>, vector<150x128xbf16>, vector<50x128xf32> -> vector<50x128xf32>
    %c0_3 = arith.constant 0 : index
    %c0_4 = arith.constant 0 : index
    %3 = vector.load %arg2[%c0_3, %c0_4] : memref<50x150xbf16, #tpu.memory_space<vmem>>, vector<50x150xbf16>
    %cst_5 = arith.constant dense<0.000000e+00> : vector<50x128xf32>
    %4 = tpu.matmul %3, %0, %cst_5 {dimension_numbers = #tpu.dot_dimension_numbers<[1], [0], [0], [1], [0, 0, 1, 1], [], []>} : vector<50x150xbf16>, vector<150x128xbf16>, vector<50x128xf32> -> vector<50x128xf32>
    %5 = arith.maximumf %2, %4 : vector<50x128xf32>
    %c0_6 = arith.constant 0 : index
    %c0_7 = arith.constant 0 : index
    %6 = vector.load %arg3[%c0_6, %c0_7] : memref<50x150xbf16, #tpu.memory_space<vmem>>, vector<50x150xbf16>
    %cst_8 = arith.constant dense<0.000000e+00> : vector<50x128xf32>
    %7 = tpu.matmul %6, %0, %cst_8 {dimension_numbers = #tpu.dot_dimension_numbers<[1], [0], [0], [1], [0, 0, 1, 1], [], []>} : vector<50x150xbf16>, vector<150x128xbf16>, vector<50x128xf32> -> vector<50x128xf32>
    %8 = arith.maximumf %5, %7 : vector<50x128xf32>
    %c0_9 = arith.constant 0 : index
    %c0_10 = arith.constant 0 : index
    %9 = vector.load %arg4[%c0_9, %c0_10] : memref<50x150xbf16, #tpu.memory_space<vmem>>, vector<50x150xbf16>
    %cst_11 = arith.constant dense<0.000000e+00> : vector<50x128xf32>
    %10 = tpu.matmul %9, %0, %cst_11 {dimension_numbers = #tpu.dot_dimension_numbers<[1], [0], [0], [1], [0, 0, 1, 1], [], []>} : vector<50x150xbf16>, vector<150x128xbf16>, vector<50x128xf32> -> vector<50x128xf32>
    %11 = arith.maximumf %8, %10 : vector<50x128xf32>
    %c0_12 = arith.constant 0 : index
    %c0_13 = arith.constant 0 : index
    %12 = vector.load %arg6[%c0_12, %c0_13] : memref<1x128xf32, #tpu.memory_space<vmem>>, vector<1x128xf32>
    %13 = vector.broadcast %12 : vector<1x128xf32> to vector<50x128xf32>
    %14 = arith.addf %11, %13 : vector<50x128xf32>
    %cst_14 = arith.constant 0.000000e+00 : f32
    %15 = vector.broadcast %cst_14 : f32 to vector<50x128xf32>
    %16 = arith.maximumf %14, %15 : vector<50x128xf32>
    %17 = arith.truncf %16 : vector<50x128xf32> to vector<50x128xbf16>
    %c0_15 = arith.constant 0 : index
    %c0_16 = arith.constant 0 : index
    %18 = vector.load %arg7[%c0_15, %c0_16] : memref<50x128xbf16, #tpu.memory_space<vmem>>, vector<50x128xbf16>
    tpu.vector_store %arg7[%c0_15, %c0_16], %17 {strides = array<i32>} : memref<50x128xbf16, #tpu.memory_space<vmem>>, vector<50x128xbf16>,
    return
  }
  func.func @transform_0(%arg0: i32) -> (i32, i32) {
    %c0_i32 = arith.constant 0 : i32
    %c0_i32_0 = arith.constant 0 : i32
    return %arg0, %c0_i32 : i32, i32
  }
  func.func @transform_1(%arg0: i32) -> (i32, i32) {
    %c0_i32 = arith.constant 0 : i32
    %c0_i32_0 = arith.constant 0 : i32
    return %arg0, %c0_i32 : i32, i32
  }
  func.func @transform_2(%arg0: i32) -> (i32, i32) {
    %c0_i32 = arith.constant 0 : i32
    %c0_i32_0 = arith.constant 0 : i32
    return %arg0, %c0_i32 : i32, i32
  }
  func.func @transform_3(%arg0: i32) -> (i32, i32) {
    %c0_i32 = arith.constant 0 : i32
    %c0_i32_0 = arith.constant 0 : i32
    return %arg0, %c0_i32 : i32, i32
  }
  func.func @transform_4(%arg0: i32) -> (i32, i32) {
    %c0_i32 = arith.constant 0 : i32
    %c0_i32_0 = arith.constant 0 : i32
    %c0_i32_1 = arith.constant 0 : i32
    return %c0_i32, %c0_i32_0 : i32, i32
  }
  func.func @transform_5(%arg0: i32) -> (i32, i32) {
    %c0_i32 = arith.constant 0 : i32
    %c0_i32_0 = arith.constant 0 : i32
    %c0_i32_1 = arith.constant 0 : i32
    return %c0_i32, %c0_i32_0 : i32, i32
  }
  func.func @transform_6(%arg0: i32) -> (i32, i32) {
    %c0_i32 = arith.constant 0 : i32
    %c0_i32_0 = arith.constant 0 : i32
    return %arg0, %c0_i32 : i32, i32
  }
}

module attributes {stable_mosaic.version = 11 : i64} {
  func.func @_mlp_kernel(%arg0: i32, %arg1: memref<2x400xbf16, #tpu.memory_space<vmem>>, %arg2: memref<400x128xbf16, #tpu.memory_space<vmem>>, %arg3: memref<1x128xf32, #tpu.memory_space<vmem>>, %arg4: memref<128x128xbf16, #tpu.memory_space<vmem>>, %arg5: memref<1x128xf32, #tpu.memory_space<vmem>>, %arg6: memref<128x128xbf16, #tpu.memory_space<vmem>>, %arg7: memref<1x128xf32, #tpu.memory_space<vmem>>, %arg8: memref<2x128xf32, #tpu.memory_space<vmem>>) attributes {dimension_semantics = [#tpu.dimension_semantics<parallel>], iteration_bounds = array<i64: 1>, scalar_prefetch = 0 : i64, scratch_operands = 0 : i64, tpu.core_type = #tpu.core_type<tc>, window_params = [{transform_indices = @transform_0, window_bounds = array<i64: 2, 400>}, {pipeline_mode = #tpu.pipeline_mode<synchronous>, transform_indices = @transform_1, window_bounds = array<i64: 400, 128>}, {pipeline_mode = #tpu.pipeline_mode<synchronous>, transform_indices = @transform_2, window_bounds = array<i64: 1, 128>}, {pipeline_mode = #tpu.pipeline_mode<synchronous>, transform_indices = @transform_3, window_bounds = array<i64: 128, 128>}, {pipeline_mode = #tpu.pipeline_mode<synchronous>, transform_indices = @transform_4, window_bounds = array<i64: 1, 128>}, {pipeline_mode = #tpu.pipeline_mode<synchronous>, transform_indices = @transform_5, window_bounds = array<i64: 128, 128>}, {pipeline_mode = #tpu.pipeline_mode<synchronous>, transform_indices = @transform_6, window_bounds = array<i64: 1, 128>}, {transform_indices = @transform_7, window_bounds = array<i64: 2, 128>}]} {
    %c0 = arith.constant 0 : index
    %c0_0 = arith.constant 0 : index
    %0 = vector.load %arg1[%c0, %c0_0] : memref<2x400xbf16, #tpu.memory_space<vmem>>, vector<2x400xbf16>
    %c0_1 = arith.constant 0 : index
    %c0_2 = arith.constant 0 : index
    %1 = vector.load %arg2[%c0_1, %c0_2] : memref<400x128xbf16, #tpu.memory_space<vmem>>, vector<400x128xbf16>
    %cst = arith.constant dense<0.000000e+00> : vector<2x128xf32>
    %2 = tpu.matmul %0, %1, %cst {dimension_numbers = #tpu.dot_dimension_numbers<[1], [0], [0], [1], [0, 0, 1, 1], [], []>} : vector<2x400xbf16>, vector<400x128xbf16>, vector<2x128xf32> -> vector<2x128xf32>
    %c0_3 = arith.constant 0 : index
    %c0_4 = arith.constant 0 : index
    %3 = vector.load %arg3[%c0_3, %c0_4] : memref<1x128xf32, #tpu.memory_space<vmem>>, vector<1x128xf32>
    %4 = vector.broadcast %3 : vector<1x128xf32> to vector<2x128xf32>
    %5 = arith.addf %2, %4 : vector<2x128xf32>
    %cst_5 = arith.constant 0.000000e+00 : f32
    %6 = vector.broadcast %cst_5 : f32 to vector<2x128xf32>
    %7 = arith.maximumf %5, %6 : vector<2x128xf32>
    %8 = arith.truncf %7 : vector<2x128xf32> to vector<2x128xbf16>
    %c0_6 = arith.constant 0 : index
    %c0_7 = arith.constant 0 : index
    %9 = vector.load %arg4[%c0_6, %c0_7] : memref<128x128xbf16, #tpu.memory_space<vmem>>, vector<128x128xbf16>
    %cst_8 = arith.constant dense<0.000000e+00> : vector<2x128xf32>
    %10 = tpu.matmul %8, %9, %cst_8 {dimension_numbers = #tpu.dot_dimension_numbers<[1], [0], [0], [1], [0, 0, 1, 1], [], []>} : vector<2x128xbf16>, vector<128x128xbf16>, vector<2x128xf32> -> vector<2x128xf32>
    %c0_9 = arith.constant 0 : index
    %c0_10 = arith.constant 0 : index
    %11 = vector.load %arg5[%c0_9, %c0_10] : memref<1x128xf32, #tpu.memory_space<vmem>>, vector<1x128xf32>
    %12 = vector.broadcast %11 : vector<1x128xf32> to vector<2x128xf32>
    %13 = arith.addf %10, %12 : vector<2x128xf32>
    %cst_11 = arith.constant 0.000000e+00 : f32
    %14 = vector.broadcast %cst_11 : f32 to vector<2x128xf32>
    %15 = arith.maximumf %13, %14 : vector<2x128xf32>
    %16 = arith.truncf %15 : vector<2x128xf32> to vector<2x128xbf16>
    %c0_12 = arith.constant 0 : index
    %c0_13 = arith.constant 0 : index
    %17 = vector.load %arg6[%c0_12, %c0_13] : memref<128x128xbf16, #tpu.memory_space<vmem>>, vector<128x128xbf16>
    %cst_14 = arith.constant dense<0.000000e+00> : vector<2x128xf32>
    %18 = tpu.matmul %16, %17, %cst_14 {dimension_numbers = #tpu.dot_dimension_numbers<[1], [0], [0], [1], [0, 0, 1, 1], [], []>} : vector<2x128xbf16>, vector<128x128xbf16>, vector<2x128xf32> -> vector<2x128xf32>
    %c0_15 = arith.constant 0 : index
    %c0_16 = arith.constant 0 : index
    %19 = vector.load %arg7[%c0_15, %c0_16] : memref<1x128xf32, #tpu.memory_space<vmem>>, vector<1x128xf32>
    %20 = vector.broadcast %19 : vector<1x128xf32> to vector<2x128xf32>
    %21 = arith.addf %18, %20 : vector<2x128xf32>
    %c0_17 = arith.constant 0 : index
    %c0_18 = arith.constant 0 : index
    %22 = vector.load %arg8[%c0_17, %c0_18] : memref<2x128xf32, #tpu.memory_space<vmem>>, vector<2x128xf32>
    tpu.vector_store %arg8[%c0_17, %c0_18], %21 {strides = array<i32>} : memref<2x128xf32, #tpu.memory_space<vmem>>, vector<2x128xf32>,
    return
  }
  func.func @transform_0(%arg0: i32) -> (i32, i32) {
    %c0_i32 = arith.constant 0 : i32
    %c0_i32_0 = arith.constant 0 : i32
    return %arg0, %c0_i32 : i32, i32
  }
  func.func @transform_1(%arg0: i32) -> (i32, i32) {
    %c0_i32 = arith.constant 0 : i32
    %c0_i32_0 = arith.constant 0 : i32
    %c0_i32_1 = arith.constant 0 : i32
    return %c0_i32, %c0_i32_0 : i32, i32
  }
  func.func @transform_2(%arg0: i32) -> (i32, i32) {
    %c0_i32 = arith.constant 0 : i32
    %c0_i32_0 = arith.constant 0 : i32
    %c0_i32_1 = arith.constant 0 : i32
    return %c0_i32, %c0_i32_0 : i32, i32
  }
  func.func @transform_3(%arg0: i32) -> (i32, i32) {
    %c0_i32 = arith.constant 0 : i32
    %c0_i32_0 = arith.constant 0 : i32
    %c0_i32_1 = arith.constant 0 : i32
    return %c0_i32, %c0_i32_0 : i32, i32
  }
  func.func @transform_4(%arg0: i32) -> (i32, i32) {
    %c0_i32 = arith.constant 0 : i32
    %c0_i32_0 = arith.constant 0 : i32
    %c0_i32_1 = arith.constant 0 : i32
    return %c0_i32, %c0_i32_0 : i32, i32
  }
  func.func @transform_5(%arg0: i32) -> (i32, i32) {
    %c0_i32 = arith.constant 0 : i32
    %c0_i32_0 = arith.constant 0 : i32
    %c0_i32_1 = arith.constant 0 : i32
    return %c0_i32, %c0_i32_0 : i32, i32
  }
  func.func @transform_6(%arg0: i32) -> (i32, i32) {
    %c0_i32 = arith.constant 0 : i32
    %c0_i32_0 = arith.constant 0 : i32
    %c0_i32_1 = arith.constant 0 : i32
    return %c0_i32, %c0_i32_0 : i32, i32
  }
  func.func @transform_7(%arg0: i32) -> (i32, i32) {
    %c0_i32 = arith.constant 0 : i32
    %c0_i32_0 = arith.constant 0 : i32
    return %arg0, %c0_i32 : i32, i32
  }
}

</mosaic_0001>

<bundles_post_ra>
// kernel: lenet_dfa_forward.3
= control target key start
LH: loop header
LB: loop body
LE: loop exit
PB: predicated region body
PF: predicated region fallthrough
CT: control target
= control target key end

     0   :  { %vm311_vm0 = vcmask 1044480   ;;  %vm312_vm1 = vcmask 1045504   ;;  %v2693_v2 = vmov 65535   ;;  %vm235_vm2 = vcmask 613376   ;;  %s3281_s4 = inlined_call_operand.vmem [shape: bf16[75,128], index: 4, kind: input, shape index: {}]   ;;  %s3282_s0 = inlined_call_operand.vmem [shape: bf16[392,75], index: 0, kind: input, shape index: {}]   ;;  %s3283_s1 = inlined_call_operand.vmem [shape: bf16[392,75], index: 1, kind: input, shape index: {}]   ;;  %s3284_s2 = inlined_call_operand.vmem [shape: bf16[392,75], index: 2, kind: input, shape index: {}]   ;;  %s3285_s3 = inlined_call_operand.vmem [shape: bf16[392,75], index: 3, kind: input, shape index: {}]   ;;  %s3286_s5 = inlined_call_operand.vmem [shape: f32[1,128], index: 5, kind: input, shape index: {}]   ;;  %s3287_s6 = inlined_call_operand.vmem [shape: bf16[392,128], index: 6, kind: output, shape index: {}]  }
   0x1   :  { %v2056_v0 = vld [vmem:[%s3281_s4 + $0x20] sm:$0xf]  ;;  %v2450_v1 = vld [vmem:[%s3281_s4 + $0x20] sm:$0x30]  ;;  %v313_v3 = vsel %vm311_vm0, 4294967295, %v2693_v2  ;;  %v2449_v7 = vld [vmem:[%s3281_s4 + $0x18] sm:$0xff] }
   0x2   :  { %v2057_v4 = vor.u32 %v2450_v1, %v2056_v0  ;;  %v314_v5 = vsel %vm312_vm1, %v313_v3, 0  ;;  %v2448_v8 = vld [vmem:[%s3281_s4 + $0x10] sm:$0xff]  ;;  %v2447_v9 = vld [vmem:[%s3281_s4 + $0x8] sm:$0xff]  ;;  %v2446_v10 = vld [vmem:[%s3281_s4] sm:$0xff] }
   0x3   :  { %v2451_v11 = vld [vmem:[%s3282_s0] sm:$0xff]  ;;  %v2452_v15 = vld [vmem:[%s3282_s0 + $0x8] sm:$0xff]  ;;  %v2453_v19 = vld [vmem:[%s3282_s0 + $0x10] sm:$0xff] }
   0x4   :  { %v316_v6 = vand.u32 %v2057_v4, %v314_v5  ;;  %v2475_v12 = vld [vmem:[%s3283_s1] sm:$0xff]  ;;  %v2476_v16 = vld [vmem:[%s3283_s1 + $0x8] sm:$0xff]  ;;  %v2477_v20 = vld [vmem:[%s3283_s1 + $0x10] sm:$0xff] }
   0x5   :  { %v2499_v13 = vld [vmem:[%s3284_s2] sm:$0xff]  ;;  %v2500_v17 = vld [vmem:[%s3284_s2 + $0x8] sm:$0xff]  ;;  %v2501_v21 = vld [vmem:[%s3284_s2 + $0x10] sm:$0xff] }
   0x6   :  { %321 = vmatpush.bf16.msra.mxu0 %v316_v6  ;;  %701 = vmatpush.bf16.msra.mxu1 %v316_v6  ;;  %v2523_v14 = vld [vmem:[%s3285_s3] sm:$0xff]  ;;  %v2524_v18 = vld [vmem:[%s3285_s3 + $0x8] sm:$0xff]  ;;  %v2525_v22 = vld [vmem:[%s3285_s3 + $0x10] sm:$0xff] }
   0x7   :  { %1130 = vmatpush.bf16.msra.mxu2 %v316_v6  ;;  %1559 = vmatpush.bf16.msra.mxu3 %v316_v6  ;;  %v2454_v23 = vld [vmem:[%s3282_s0 + $0x18] sm:$0xff]  ;;  %v2455_v27 = vld [vmem:[%s3282_s0 + $0x20] sm:$0xff]  ;;  %v2456_v31 = vld [vmem:[%s3282_s0 + $0x28] sm:$0xff] }
   0x8   :  { %v2478_v24 = vld [vmem:[%s3283_s1 + $0x18] sm:$0xff]  ;;  %v2479_v28 = vld [vmem:[%s3283_s1 + $0x20] sm:$0xff]  ;;  %v2480_v32 = vld [vmem:[%s3283_s1 + $0x28] sm:$0xff] }
   0x9   :  { %v2502_v25 = vld [vmem:[%s3284_s2 + $0x18] sm:$0xff]  ;;  %v2503_v29 = vld [vmem:[%s3284_s2 + $0x20] sm:$0xff]  ;;  %v2504_v33 = vld [vmem:[%s3284_s2 + $0x28] sm:$0xff] }
   0xa   :  { %322 = vmatpush.bf16.msra.mxu0 %v2449_v7  ;;  %702 = vmatpush.bf16.msra.mxu1 %v2449_v7  ;;  %v2526_v26 = vld [vmem:[%s3285_s3 + $0x18] sm:$0xff]  ;;  %v2527_v30 = vld [vmem:[%s3285_s3 + $0x20] sm:$0xff]  ;;  %v2528_v34 = vld [vmem:[%s3285_s3 + $0x28] sm:$0xff] }
   0xb   :  { %1131 = vmatpush.bf16.msra.mxu2 %v2449_v7  ;;  %1560 = vmatpush.bf16.msra.mxu3 %v2449_v7  ;;  %v2457_v35 = vld [vmem:[%s3282_s0 + $0x30] sm:$0xff]  ;;  %v2458_v39 = vld [vmem:[%s3282_s0 + $0x38] sm:$0xff]  ;;  %v2459_v43 = vld [vmem:[%s3282_s0 + $0x40] sm:$0xff] }
   0xc   :  { %v2481_v36 = vld [vmem:[%s3283_s1 + $0x30] sm:$0xff]  ;;  %v2482_v40 = vld [vmem:[%s3283_s1 + $0x38] sm:$0xff]  ;;  %v2483_v44 = vld [vmem:[%s3283_s1 + $0x40] sm:$0xff] }
   0xd   :  { %v2505_v37 = vld [vmem:[%s3284_s2 + $0x30] sm:$0xff]  ;;  %v2506_v41 = vld [vmem:[%s3284_s2 + $0x38] sm:$0xff]  ;;  %v2507_v47 = vld [vmem:[%s3284_s2 + $0x40] sm:$0xff] }
   0xe   :  { %323 = vmatpush.bf16.msra.mxu0 %v2448_v8  ;;  %703 = vmatpush.bf16.msra.mxu1 %v2448_v8  ;;  %v2529_v38 = vld [vmem:[%s3285_s3 + $0x30] sm:$0xff]  ;;  %v2530_v42 = vld [vmem:[%s3285_s3 + $0x38] sm:$0xff]  ;;  %v2531_v48 = vld [vmem:[%s3285_s3 + $0x40] sm:$0xff] }
   0xf   :  { %1132 = vmatpush.bf16.msra.mxu2 %v2448_v8  ;;  %1561 = vmatpush.bf16.msra.mxu3 %v2448_v8  ;;  %v2894_v56 = vld [vmem:[%s3286_s5] ss:$0 sm:$0xff]  ;;  %v2460_v60 = vld [vmem:[%s3282_s0 + $0x48] sm:$0xff] }
  0x10   :  { %v2484_v61 = vld [vmem:[%s3283_s1 + $0x48] sm:$0xff] }
  0x11   :  { %v2508_v1 = vld [vmem:[%s3284_s2 + $0x48] sm:$0xff] }
  0x12   :  { %324 = vmatpush.bf16.msra.mxu0 %v2447_v9  ;;  %704 = vmatpush.bf16.msra.mxu1 %v2447_v9  ;;  %v2532_v2 = vld [vmem:[%s3285_s3 + $0x48] sm:$0xff] }
  0x13   :  { %1133 = vmatpush.bf16.msra.mxu2 %v2447_v9  ;;  %1562 = vmatpush.bf16.msra.mxu3 %v2447_v9 }
  0x16   :  { %325 = vmatpush.bf16.msra.mxu0 %v2446_v10  ;;  %705 = vmatpush.bf16.msra.mxu1 %v2446_v10 }
  0x17   :  { %1134 = vmatpush.bf16.msra.mxu2 %v2446_v10  ;;  %1563 = vmatpush.bf16.msra.mxu3 %v2446_v10 }
  0x19   :  { %2058 = vmatmul.msk.bf16.vlgmr.msra.gmra.mxu0 %vm235_vm2, %v2451_v11  ;;  %2179 = vmatmul.msk.bf16.vlgmr.msra.gmra.mxu1 %vm235_vm2, %v2475_v12 }
  0x1a   :  { %2300 = vmatmul.msk.bf16.vlgmr.msra.gmra.mxu2 %vm235_vm2, %v2499_v13  ;;  %2421 = vmatmul.msk.bf16.vlgmr.msra.gmra.mxu3 %vm235_vm2, %v2523_v14 }
  0x29   :  { %2059 = vmatmul.msk.bf16.gmra.mxu0 %vm235_vm2, %v2452_v15  ;;  %2180 = vmatmul.msk.bf16.gmra.mxu1 %vm235_vm2, %v2476_v16 }
  0x2a   :  { %2301 = vmatmul.msk.bf16.gmra.mxu2 %vm235_vm2, %v2500_v17  ;;  %2422 = vmatmul.msk.bf16.gmra.mxu3 %vm235_vm2, %v2524_v18 }
  0x39   :  { %2060 = vmatmul.msk.bf16.gmra.mxu0 %vm235_vm2, %v2453_v19  ;;  %2181 = vmatmul.msk.bf16.gmra.mxu1 %vm235_vm2, %v2477_v20  ;;  %v2461_v19 = vld [vmem:[%s3282_s0 + $0x50] sm:$0xff] }
  0x3a   :  { %2302 = vmatmul.msk.bf16.gmra.mxu2 %vm235_vm2, %v2501_v21  ;;  %2423 = vmatmul.msk.bf16.gmra.mxu3 %vm235_vm2, %v2525_v22  ;;  %v2485_v20 = vld [vmem:[%s3283_s1 + $0x50] sm:$0xff] }
  0x49   :  { %2061 = vmatmul.msk.bf16.gmra.mxu0 %vm235_vm2, %v2454_v23  ;;  %2182 = vmatmul.msk.bf16.gmra.mxu1 %vm235_vm2, %v2478_v24  ;;  %v2509_v24 = vld [vmem:[%s3284_s2 + $0x50] sm:$0xff] }
  0x4a   :  { %2303 = vmatmul.msk.bf16.gmra.mxu2 %vm235_vm2, %v2502_v25  ;;  %2424 = vmatmul.msk.bf16.gmra.mxu3 %vm235_vm2, %v2526_v26  ;;  %v2533_v25 = vld [vmem:[%s3285_s3 + $0x50] sm:$0xff] }
  0x59   :  { %2062 = vmatmul.msk.bf16.gmra.mxu0 %vm235_vm2, %v2455_v27  ;;  %2183 = vmatmul.msk.bf16.gmra.mxu1 %vm235_vm2, %v2479_v28 }
  0x5a   :  { %2304 = vmatmul.msk.bf16.gmra.mxu2 %vm235_vm2, %v2503_v29  ;;  %2425 = vmatmul.msk.bf16.gmra.mxu3 %vm235_vm2, %v2527_v30 }
  0x69   :  { %2063 = vmatmul.msk.bf16.gmra.mxu0 %vm235_vm2, %v2456_v31  ;;  %2184 = vmatmul.msk.bf16.gmra.mxu1 %vm235_vm2, %v2480_v32 }
  0x6a   :  { %2305 = vmatmul.msk.bf16.gmra.mxu2 %vm235_vm2, %v2504_v33  ;;  %2426 = vmatmul.msk.bf16.gmra.mxu3 %vm235_vm2, %v2528_v34 }
  0x79   :  { %2064 = vmatmul.msk.bf16.gmra.mxu0 %vm235_vm2, %v2457_v35  ;;  %2185 = vmatmul.msk.bf16.gmra.mxu1 %vm235_vm2, %v2481_v36 }
  0x7a   :  { %2306 = vmatmul.msk.bf16.gmra.mxu2 %vm235_vm2, %v2505_v37  ;;  %2427 = vmatmul.msk.bf16.gmra.mxu3 %vm235_vm2, %v2529_v38 }
  0x89   :  { %2065 = vmatmul.msk.bf16.gmra.mxu0 %vm235_vm2, %v2458_v39  ;;  %2186 = vmatmul.msk.bf16.gmra.mxu1 %vm235_vm2, %v2482_v40 }
  0x8a   :  { %2307 = vmatmul.msk.bf16.gmra.mxu2 %vm235_vm2, %v2506_v41  ;;  %2428 = vmatmul.msk.bf16.gmra.mxu3 %vm235_vm2, %v2530_v42  ;;  %v2462_v42 = vld [vmem:[%s3282_s0 + $0x58] sm:$0xff] }
  0x96   :  { %v327_v45 = vpop.f32.mrf.mxu0  ;;  %v707_v46 = vpop.f32.mrf.mxu1 }
  0x97   :  { %v831_v49 = vmax.f32 %v327_v45, %v707_v46 }
  0x99   :  { %2066 = vmatmul.msk.bf16.gmra.mxu0 %vm235_vm2, %v2459_v43  ;;  %2187 = vmatmul.msk.bf16.gmra.mxu1 %vm235_vm2, %v2483_v44  ;;  %v2486_v43 = vld [vmem:[%s3283_s1 + $0x58] sm:$0xff] }
  0x9a   :  { %2308 = vmatmul.msk.bf16.gmra.mxu2 %vm235_vm2, %v2507_v47  ;;  %2429 = vmatmul.msk.bf16.gmra.mxu3 %vm235_vm2, %v2531_v48  ;;  %v2510_v47 = vld [vmem:[%s3284_s2 + $0x58] sm:$0xff] }
  0x9b   :  { %v2534_v48 = vld [vmem:[%s3285_s3 + $0x58] sm:$0xff] }
  0x9d   :  { %v1136_v50 = vpop.f32.mrf.mxu2  ;;  %v1565_v51 = vpop.f32.mrf.mxu3 }
  0x9e   :  { %v329_v52 = vpop.f32.mrf.mxu0  ;;  %v709_v53 = vpop.f32.mrf.mxu1  ;;  %v1260_v54 = vmax.f32 %v831_v49, %v1136_v50 }
  0x9f   :  { %v832_v57 = vmax.f32 %v329_v52, %v709_v53 }
  0xa0   :  { %v1689_v55 = vmax.f32 %v1260_v54, %v1565_v51 }
  0xa2   :  { %v1742_v3 = vadd.f32 %v2894_v56, %v1689_v55 }
  0xa4   :  { %v1791_v6 = vmax.f32 %v1742_v3, 0.0  ;;  %v2487_v3 = vld [vmem:[%s3283_s1 + $0x60] sm:$0xff] }
  0xa5   :  { %v1138_v58 = vpop.f32.mrf.mxu2  ;;  %v1567_v59 = vpop.f32.mrf.mxu3 }
  0xa6   :  { %v1261_v62 = vmax.f32 %v832_v57, %v1138_v58  ;;  %v332_v63 = vpop.f32.mrf.mxu0  ;;  %v712_v0 = vpop.f32.mrf.mxu1 }
  0xa7   :  { %v833_v8 = vmax.f32 %v332_v63, %v712_v0 }
  0xa8   :  { %v1690_v4 = vmax.f32 %v1261_v62, %v1567_v59 }
  0xa9   :  { %2067 = vmatmul.msk.bf16.gmra.mxu0 %vm235_vm2, %v2460_v60  ;;  %2188 = vmatmul.msk.bf16.gmra.mxu1 %vm235_vm2, %v2484_v61 }
  0xaa   :  { %v1743_v5 = vadd.f32 %v2894_v56, %v1690_v4  ;;  %2309 = vmatmul.msk.bf16.gmra.mxu2 %vm235_vm2, %v2508_v1  ;;  %2430 = vmatmul.msk.bf16.gmra.mxu3 %vm235_vm2, %v2532_v2  ;;  %v2463_v2 = vld [vmem:[%s3282_s0 + $0x60] sm:$0xff] }
  0xac   :  { %v1792_v7 = vmax.f32 %v1743_v5, 0.0 }
  0xad   :  { %v1141_v9 = vpop.f32.mrf.mxu2  ;;  %v1570_v10 = vpop.f32.mrf.mxu3 }
  0xae   :  { %v2550_v11 = vpack.c.bf16 %v1792_v7, %v1791_v6  ;;  %v334_v12 = vpop.f32.mrf.mxu0  ;;  %v714_v13 = vpop.f32.mrf.mxu1  ;;  %v1262_v14 = vmax.f32 %v833_v8, %v1141_v9  ;;  %v2511_v7 = vld [vmem:[%s3284_s2 + $0x60] sm:$0xff] }
  0xaf   :  { %v834_v16 = vmax.f32 %v334_v12, %v714_v13  ;;  %v2535_v8 = vld [vmem:[%s3285_s3 + $0x60] sm:$0xff] }
  0xb0   :  { %2551 = vst [vmem:[%s3287_s6] sm:$0xff] %v2550_v11   ;;  %v1691_v15 = vmax.f32 %v1262_v14, %v1570_v10 }
  0xb2   :  { %v1744_v26 = vadd.f32 %v2894_v56, %v1691_v15 }
  0xb4   :  { %v1793_v29 = vmax.f32 %v1744_v26, 0.0  ;;  %v2488_v26 = vld [vmem:[%s3283_s1 + $0x68] sm:$0xff] }
  0xb5   :  { %v1143_v17 = vpop.f32.mrf.mxu2  ;;  %v1572_v18 = vpop.f32.mrf.mxu3 }
  0xb6   :  { %v1263_v21 = vmax.f32 %v834_v16, %v1143_v17  ;;  %v337_v22 = vpop.f32.mrf.mxu0  ;;  %v717_v23 = vpop.f32.mrf.mxu1 }
  0xb7   :  { %v835_v31 = vmax.f32 %v337_v22, %v717_v23 }
  0xb8   :  { %v1692_v27 = vmax.f32 %v1263_v21, %v1572_v18 }
  0xb9   :  { %2068 = vmatmul.msk.bf16.gmra.mxu0 %vm235_vm2, %v2461_v19  ;;  %2189 = vmatmul.msk.bf16.gmra.mxu1 %vm235_vm2, %v2485_v20 }
  0xba   :  { %v1745_v28 = vadd.f32 %v2894_v56, %v1692_v27  ;;  %2310 = vmatmul.msk.bf16.gmra.mxu2 %vm235_vm2, %v2509_v24  ;;  %2431 = vmatmul.msk.bf16.gmra.mxu3 %vm235_vm2, %v2533_v25  ;;  %v2464_v25 = vld [vmem:[%s3282_s0 + $0x68] sm:$0xff] }
  0xbc   :  { %v1794_v30 = vmax.f32 %v1745_v28, 0.0 }
  0xbd   :  { %v1146_v32 = vpop.f32.mrf.mxu2  ;;  %v1575_v33 = vpop.f32.mrf.mxu3 }
  0xbe   :  { %v2555_v34 = vpack.c.bf16 %v1794_v30, %v1793_v29  ;;  %v339_v35 = vpop.f32.mrf.mxu0  ;;  %v719_v36 = vpop.f32.mrf.mxu1  ;;  %v1264_v37 = vmax.f32 %v835_v31, %v1146_v32  ;;  %v2512_v30 = vld [vmem:[%s3284_s2 + $0x68] sm:$0xff] }
  0xbf   :  { %v836_v39 = vmax.f32 %v339_v35, %v719_v36  ;;  %v2536_v31 = vld [vmem:[%s3285_s3 + $0x68] sm:$0xff] }
  0xc0   :  { %2667 = vst [vmem:[%s3287_s6 + $0x8] sm:$0xff] %v2555_v34   ;;  %v1693_v38 = vmax.f32 %v1264_v37, %v1575_v33 }
  0xc2   :  { %v1746_v49 = vadd.f32 %v2894_v56, %v1693_v38 }
  0xc4   :  { %v1795_v52 = vmax.f32 %v1746_v49, 0.0  ;;  %v2489_v49 = vld [vmem:[%s3283_s1 + $0x70] sm:$0xff] }
  0xc5   :  { %v1148_v40 = vpop.f32.mrf.mxu2  ;;  %v1577_v41 = vpop.f32.mrf.mxu3 }
  0xc6   :  { %v1265_v44 = vmax.f32 %v836_v39, %v1148_v40  ;;  %v342_v45 = vpop.f32.mrf.mxu0  ;;  %v722_v46 = vpop.f32.mrf.mxu1 }
  0xc7   :  { %v837_v54 = vmax.f32 %v342_v45, %v722_v46 }
  0xc8   :  { %v1694_v50 = vmax.f32 %v1265_v44, %v1577_v41 }
  0xc9   :  { %2069 = vmatmul.msk.bf16.gmra.mxu0 %vm235_vm2, %v2462_v42  ;;  %2190 = vmatmul.msk.bf16.gmra.mxu1 %vm235_vm2, %v2486_v43 }
  0xca   :  { %v1747_v51 = vadd.f32 %v2894_v56, %v1694_v50  ;;  %2311 = vmatmul.msk.bf16.gmra.mxu2 %vm235_vm2, %v2510_v47  ;;  %2432 = vmatmul.msk.bf16.gmra.mxu3 %vm235_vm2, %v2534_v48  ;;  %v2465_v48 = vld [vmem:[%s3282_s0 + $0x70] sm:$0xff] }
  0xcc   :  { %v1796_v53 = vmax.f32 %v1747_v51, 0.0 }
  0xcd   :  { %v1151_v55 = vpop.f32.mrf.mxu2  ;;  %v1580_v57 = vpop.f32.mrf.mxu3 }
  0xce   :  { %v2560_v58 = vpack.c.bf16 %v1796_v53, %v1795_v52  ;;  %v344_v59 = vpop.f32.mrf.mxu0  ;;  %v724_v60 = vpop.f32.mrf.mxu1  ;;  %v1266_v61 = vmax.f32 %v837_v54, %v1151_v55  ;;  %v2513_v53 = vld [vmem:[%s3284_s2 + $0x70] sm:$0xff] }
  0xcf   :  { %v838_v63 = vmax.f32 %v344_v59, %v724_v60  ;;  %v2537_v54 = vld [vmem:[%s3285_s3 + $0x70] sm:$0xff] }
  0xd0   :  { %2668 = vst [vmem:[%s3287_s6 + $0x10] sm:$0xff] %v2560_v58   ;;  %v1695_v62 = vmax.f32 %v1266_v61, %v1580_v57 }
  0xd2   :  { %v1748_v9 = vadd.f32 %v2894_v56, %v1695_v62 }
  0xd4   :  { %v1797_v12 = vmax.f32 %v1748_v9, 0.0  ;;  %v2490_v9 = vld [vmem:[%s3283_s1 + $0x78] sm:$0xff] }
  0xd5   :  { %v1153_v0 = vpop.f32.mrf.mxu2  ;;  %v1582_v1 = vpop.f32.mrf.mxu3 }
  0xd6   :  { %v1267_v4 = vmax.f32 %v838_v63, %v1153_v0  ;;  %v347_v5 = vpop.f32.mrf.mxu0  ;;  %v727_v6 = vpop.f32.mrf.mxu1 }
  0xd7   :  { %v839_v14 = vmax.f32 %v347_v5, %v727_v6 }
  0xd8   :  { %v1696_v10 = vmax.f32 %v1267_v4, %v1582_v1 }
  0xd9   :  { %2070 = vmatmul.msk.bf16.gmra.mxu0 %vm235_vm2, %v2463_v2  ;;  %2191 = vmatmul.msk.bf16.gmra.mxu1 %vm235_vm2, %v2487_v3 }
  0xda   :  { %v1749_v11 = vadd.f32 %v2894_v56, %v1696_v10  ;;  %2312 = vmatmul.msk.bf16.gmra.mxu2 %vm235_vm2, %v2511_v7  ;;  %2433 = vmatmul.msk.bf16.gmra.mxu3 %vm235_vm2, %v2535_v8  ;;  %v2466_v8 = vld [vmem:[%s3282_s0 + $0x78] sm:$0xff] }
  0xdc   :  { %v1798_v13 = vmax.f32 %v1749_v11, 0.0 }
  0xdd   :  { %v1156_v15 = vpop.f32.mrf.mxu2  ;;  %v1585_v16 = vpop.f32.mrf.mxu3 }
  0xde   :  { %v2565_v17 = vpack.c.bf16 %v1798_v13, %v1797_v12  ;;  %v349_v18 = vpop.f32.mrf.mxu0  ;;  %v729_v19 = vpop.f32.mrf.mxu1  ;;  %v1268_v20 = vmax.f32 %v839_v14, %v1156_v15  ;;  %v2514_v13 = vld [vmem:[%s3284_s2 + $0x78] sm:$0xff] }
  0xdf   :  { %v840_v22 = vmax.f32 %v349_v18, %v729_v19  ;;  %v2538_v14 = vld [vmem:[%s3285_s3 + $0x78] sm:$0xff] }
  0xe0   :  { %2669 = vst [vmem:[%s3287_s6 + $0x18] sm:$0xff] %v2565_v17   ;;  %v1697_v21 = vmax.f32 %v1268_v20, %v1585_v16 }
  0xe2   :  { %v1750_v32 = vadd.f32 %v2894_v56, %v1697_v21 }
  0xe4   :  { %v1799_v35 = vmax.f32 %v1750_v32, 0.0  ;;  %v2491_v32 = vld [vmem:[%s3283_s1 + $0x80] sm:$0xff] }
  0xe5   :  { %v1158_v23 = vpop.f32.mrf.mxu2  ;;  %v1587_v24 = vpop.f32.mrf.mxu3 }
  0xe6   :  { %v1269_v27 = vmax.f32 %v840_v22, %v1158_v23  ;;  %v352_v28 = vpop.f32.mrf.mxu0  ;;  %v732_v29 = vpop.f32.mrf.mxu1 }
  0xe7   :  { %v841_v37 = vmax.f32 %v352_v28, %v732_v29 }
  0xe8   :  { %v1698_v33 = vmax.f32 %v1269_v27, %v1587_v24 }
  0xe9   :  { %2071 = vmatmul.msk.bf16.gmra.mxu0 %vm235_vm2, %v2464_v25  ;;  %2192 = vmatmul.msk.bf16.gmra.mxu1 %vm235_vm2, %v2488_v26 }
  0xea   :  { %v1751_v34 = vadd.f32 %v2894_v56, %v1698_v33  ;;  %2313 = vmatmul.msk.bf16.gmra.mxu2 %vm235_vm2, %v2512_v30  ;;  %2434 = vmatmul.msk.bf16.gmra.mxu3 %vm235_vm2, %v2536_v31  ;;  %v2467_v31 = vld [vmem:[%s3282_s0 + $0x80] sm:$0xff] }
  0xec   :  { %v1800_v36 = vmax.f32 %v1751_v34, 0.0 }
  0xed   :  { %v1161_v38 = vpop.f32.mrf.mxu2  ;;  %v1590_v39 = vpop.f32.mrf.mxu3 }
  0xee   :  { %v2570_v40 = vpack.c.bf16 %v1800_v36, %v1799_v35  ;;  %v354_v41 = vpop.f32.mrf.mxu0  ;;  %v734_v42 = vpop.f32.mrf.mxu1  ;;  %v1270_v43 = vmax.f32 %v841_v37, %v1161_v38  ;;  %v2515_v36 = vld [vmem:[%s3284_s2 + $0x80] sm:$0xff] }
  0xef   :  { %v842_v45 = vmax.f32 %v354_v41, %v734_v42  ;;  %v2539_v37 = vld [vmem:[%s3285_s3 + $0x80] sm:$0xff] }
  0xf0   :  { %2670 = vst [vmem:[%s3287_s6 + $0x20] sm:$0xff] %v2570_v40   ;;  %v1699_v44 = vmax.f32 %v1270_v43, %v1590_v39 }
  0xf2   :  { %v1752_v55 = vadd.f32 %v2894_v56, %v1699_v44 }
  0xf4   :  { %v1801_v59 = vmax.f32 %v1752_v55, 0.0  ;;  %v2492_v55 = vld [vmem:[%s3283_s1 + $0x88] sm:$0xff] }
  0xf5   :  { %v1163_v46 = vpop.f32.mrf.mxu2  ;;  %v1592_v47 = vpop.f32.mrf.mxu3 }
  0xf6   :  { %v1271_v50 = vmax.f32 %v842_v45, %v1163_v46  ;;  %v357_v51 = vpop.f32.mrf.mxu0  ;;  %v737_v52 = vpop.f32.mrf.mxu1 }
  0xf7   :  { %v843_v61 = vmax.f32 %v357_v51, %v737_v52 }
  0xf8   :  { %v1700_v57 = vmax.f32 %v1271_v50, %v1592_v47 }
  0xf9   :  { %2072 = vmatmul.msk.bf16.gmra.mxu0 %vm235_vm2, %v2465_v48  ;;  %2193 = vmatmul.msk.bf16.gmra.mxu1 %vm235_vm2, %v2489_v49 }
  0xfa   :  { %v1753_v58 = vadd.f32 %v2894_v56, %v1700_v57  ;;  %2314 = vmatmul.msk.bf16.gmra.mxu2 %vm235_vm2, %v2513_v53  ;;  %2435 = vmatmul.msk.bf16.gmra.mxu3 %vm235_vm2, %v2537_v54  ;;  %v2468_v54 = vld [vmem:[%s3282_s0 + $0x88] sm:$0xff] }
  0xfc   :  { %v1802_v60 = vmax.f32 %v1753_v58, 0.0 }
  0xfd   :  { %v1166_v62 = vpop.f32.mrf.mxu2  ;;  %v1595_v63 = vpop.f32.mrf.mxu3 }
  0xfe   :  { %v2575_v0 = vpack.c.bf16 %v1802_v60, %v1801_v59  ;;  %v359_v1 = vpop.f32.mrf.mxu0  ;;  %v739_v2 = vpop.f32.mrf.mxu1  ;;  %v1272_v3 = vmax.f32 %v843_v61, %v1166_v62  ;;  %v2516_v60 = vld [vmem:[%s3284_s2 + $0x88] sm:$0xff] }
  0xff   :  { %v844_v5 = vmax.f32 %v359_v1, %v739_v2  ;;  %v2540_v61 = vld [vmem:[%s3285_s3 + $0x88] sm:$0xff] }
 0x100   :  { %2671 = vst [vmem:[%s3287_s6 + $0x28] sm:$0xff] %v2575_v0   ;;  %v1701_v4 = vmax.f32 %v1272_v3, %v1595_v63 }
 0x102   :  { %v1754_v15 = vadd.f32 %v2894_v56, %v1701_v4 }
 0x104   :  { %v1803_v18 = vmax.f32 %v1754_v15, 0.0  ;;  %v2493_v15 = vld [vmem:[%s3283_s1 + $0x90] sm:$0xff] }
 0x105   :  { %v1168_v6 = vpop.f32.mrf.mxu2  ;;  %v1597_v7 = vpop.f32.mrf.mxu3 }
 0x106   :  { %v1273_v10 = vmax.f32 %v844_v5, %v1168_v6  ;;  %v362_v11 = vpop.f32.mrf.mxu0  ;;  %v742_v12 = vpop.f32.mrf.mxu1 }
 0x107   :  { %v845_v20 = vmax.f32 %v362_v11, %v742_v12 }
 0x108   :  { %v1702_v16 = vmax.f32 %v1273_v10, %v1597_v7 }
 0x109   :  { %2073 = vmatmul.msk.bf16.gmra.mxu0 %vm235_vm2, %v2466_v8  ;;  %2194 = vmatmul.msk.bf16.gmra.mxu1 %vm235_vm2, %v2490_v9 }
 0x10a   :  { %v1755_v17 = vadd.f32 %v2894_v56, %v1702_v16  ;;  %2315 = vmatmul.msk.bf16.gmra.mxu2 %vm235_vm2, %v2514_v13  ;;  %2436 = vmatmul.msk.bf16.gmra.mxu3 %vm235_vm2, %v2538_v14  ;;  %v2469_v14 = vld [vmem:[%s3282_s0 + $0x90] sm:$0xff] }
 0x10c   :  { %v1804_v19 = vmax.f32 %v1755_v17, 0.0 }
 0x10d   :  { %v1171_v21 = vpop.f32.mrf.mxu2  ;;  %v1600_v22 = vpop.f32.mrf.mxu3 }
 0x10e   :  { %v2580_v23 = vpack.c.bf16 %v1804_v19, %v1803_v18  ;;  %v364_v24 = vpop.f32.mrf.mxu0  ;;  %v744_v25 = vpop.f32.mrf.mxu1  ;;  %v1274_v26 = vmax.f32 %v845_v20, %v1171_v21  ;;  %v2517_v19 = vld [vmem:[%s3284_s2 + $0x90] sm:$0xff] }
 0x10f   :  { %v846_v28 = vmax.f32 %v364_v24, %v744_v25  ;;  %v2541_v20 = vld [vmem:[%s3285_s3 + $0x90] sm:$0xff] }
 0x110   :  { %2672 = vst [vmem:[%s3287_s6 + $0x30] sm:$0xff] %v2580_v23   ;;  %v1703_v27 = vmax.f32 %v1274_v26, %v1600_v22 }
 0x112   :  { %v1756_v38 = vadd.f32 %v2894_v56, %v1703_v27 }
 0x114   :  { %v1805_v41 = vmax.f32 %v1756_v38, 0.0  ;;  %v2494_v38 = vld [vmem:[%s3283_s1 + $0x98] sm:$0xff] }
 0x115   :  { %v1173_v29 = vpop.f32.mrf.mxu2  ;;  %v1602_v30 = vpop.f32.mrf.mxu3 }
 0x116   :  { %v1275_v33 = vmax.f32 %v846_v28, %v1173_v29  ;;  %v367_v34 = vpop.f32.mrf.mxu0  ;;  %v747_v35 = vpop.f32.mrf.mxu1 }
 0x117   :  { %v847_v43 = vmax.f32 %v367_v34, %v747_v35 }
 0x118   :  { %v1704_v39 = vmax.f32 %v1275_v33, %v1602_v30 }
 0x119   :  { %2074 = vmatmul.msk.bf16.gmra.mxu0 %vm235_vm2, %v2467_v31  ;;  %2195 = vmatmul.msk.bf16.gmra.mxu1 %vm235_vm2, %v2491_v32 }
 0x11a   :  { %v1757_v40 = vadd.f32 %v2894_v56, %v1704_v39  ;;  %2316 = vmatmul.msk.bf16.gmra.mxu2 %vm235_vm2, %v2515_v36  ;;  %2437 = vmatmul.msk.bf16.gmra.mxu3 %vm235_vm2, %v2539_v37  ;;  %v2470_v37 = vld [vmem:[%s3282_s0 + $0x98] sm:$0xff] }
 0x11c   :  { %v1806_v42 = vmax.f32 %v1757_v40, 0.0 }
 0x11d   :  { %v1176_v44 = vpop.f32.mrf.mxu2  ;;  %v1605_v45 = vpop.f32.mrf.mxu3 }
 0x11e   :  { %v2585_v46 = vpack.c.bf16 %v1806_v42, %v1805_v41  ;;  %v369_v47 = vpop.f32.mrf.mxu0  ;;  %v749_v48 = vpop.f32.mrf.mxu1  ;;  %v1276_v49 = vmax.f32 %v847_v43, %v1176_v44  ;;  %v2518_v42 = vld [vmem:[%s3284_s2 + $0x98] sm:$0xff] }
 0x11f   :  { %v848_v51 = vmax.f32 %v369_v47, %v749_v48  ;;  %v2542_v43 = vld [vmem:[%s3285_s3 + $0x98] sm:$0xff] }
 0x120   :  { %2673 = vst [vmem:[%s3287_s6 + $0x38] sm:$0xff] %v2585_v46   ;;  %v1705_v50 = vmax.f32 %v1276_v49, %v1605_v45 }
 0x122   :  { %v1758_v62 = vadd.f32 %v2894_v56, %v1705_v50 }
 0x124   :  { %v1807_v1 = vmax.f32 %v1758_v62, 0.0  ;;  %v2495_v62 = vld [vmem:[%s3283_s1 + $0xa0] sm:$0xff] }
 0x125   :  { %v1178_v52 = vpop.f32.mrf.mxu2  ;;  %v1607_v53 = vpop.f32.mrf.mxu3 }
 0x126   :  { %v1277_v57 = vmax.f32 %v848_v51, %v1178_v52  ;;  %v372_v58 = vpop.f32.mrf.mxu0  ;;  %v752_v59 = vpop.f32.mrf.mxu1 }
 0x127   :  { %v849_v3 = vmax.f32 %v372_v58, %v752_v59 }
 0x128   :  { %v1706_v63 = vmax.f32 %v1277_v57, %v1607_v53 }
 0x129   :  { %2075 = vmatmul.msk.bf16.gmra.mxu0 %vm235_vm2, %v2468_v54  ;;  %2196 = vmatmul.msk.bf16.gmra.mxu1 %vm235_vm2, %v2492_v55 }
 0x12a   :  { %v1759_v0 = vadd.f32 %v2894_v56, %v1706_v63  ;;  %2317 = vmatmul.msk.bf16.gmra.mxu2 %vm235_vm2, %v2516_v60  ;;  %2438 = vmatmul.msk.bf16.gmra.mxu3 %vm235_vm2, %v2540_v61  ;;  %v2471_v61 = vld [vmem:[%s3282_s0 + $0xa0] sm:$0xff] }
 0x12c   :  { %v1808_v2 = vmax.f32 %v1759_v0, 0.0 }
 0x12d   :  { %v1181_v4 = vpop.f32.mrf.mxu2  ;;  %v1610_v5 = vpop.f32.mrf.mxu3 }
 0x12e   :  { %v2590_v6 = vpack.c.bf16 %v1808_v2, %v1807_v1  ;;  %v374_v7 = vpop.f32.mrf.mxu0  ;;  %v754_v8 = vpop.f32.mrf.mxu1  ;;  %v1278_v9 = vmax.f32 %v849_v3, %v1181_v4  ;;  %v2519_v2 = vld [vmem:[%s3284_s2 + $0xa0] sm:$0xff] }
 0x12f   :  { %v850_v11 = vmax.f32 %v374_v7, %v754_v8  ;;  %v2543_v3 = vld [vmem:[%s3285_s3 + $0xa0] sm:$0xff] }
 0x130   :  { %2674 = vst [vmem:[%s3287_s6 + $0x40] sm:$0xff] %v2590_v6   ;;  %v1707_v10 = vmax.f32 %v1278_v9, %v1610_v5 }
 0x132   :  { %v1760_v21 = vadd.f32 %v2894_v56, %v1707_v10 }
 0x134   :  { %v1809_v24 = vmax.f32 %v1760_v21, 0.0  ;;  %v2496_v21 = vld [vmem:[%s3283_s1 + $0xa8] sm:$0xff] }
 0x135   :  { %v1183_v12 = vpop.f32.mrf.mxu2  ;;  %v1612_v13 = vpop.f32.mrf.mxu3 }
 0x136   :  { %v1279_v16 = vmax.f32 %v850_v11, %v1183_v12  ;;  %v377_v17 = vpop.f32.mrf.mxu0  ;;  %v757_v18 = vpop.f32.mrf.mxu1 }
 0x137   :  { %v851_v26 = vmax.f32 %v377_v17, %v757_v18 }
 0x138   :  { %v1708_v22 = vmax.f32 %v1279_v16, %v1612_v13 }
 0x139   :  { %2076 = vmatmul.msk.bf16.gmra.mxu0 %vm235_vm2, %v2469_v14  ;;  %2197 = vmatmul.msk.bf16.gmra.mxu1 %vm235_vm2, %v2493_v15 }
 0x13a   :  { %v1761_v23 = vadd.f32 %v2894_v56, %v1708_v22  ;;  %2318 = vmatmul.msk.bf16.gmra.mxu2 %vm235_vm2, %v2517_v19  ;;  %2439 = vmatmul.msk.bf16.gmra.mxu3 %vm235_vm2, %v2541_v20  ;;  %v2472_v20 = vld [vmem:[%s3282_s0 + $0xa8] sm:$0xff] }
 0x13c   :  { %v1810_v25 = vmax.f32 %v1761_v23, 0.0 }
 0x13d   :  { %v1186_v27 = vpop.f32.mrf.mxu2  ;;  %v1615_v28 = vpop.f32.mrf.mxu3 }
 0x13e   :  { %v2595_v29 = vpack.c.bf16 %v1810_v25, %v1809_v24  ;;  %v379_v30 = vpop.f32.mrf.mxu0  ;;  %v759_v31 = vpop.f32.mrf.mxu1  ;;  %v1280_v32 = vmax.f32 %v851_v26, %v1186_v27  ;;  %v2520_v25 = vld [vmem:[%s3284_s2 + $0xa8] sm:$0xff] }
 0x13f   :  { %v852_v34 = vmax.f32 %v379_v30, %v759_v31  ;;  %v2544_v26 = vld [vmem:[%s3285_s3 + $0xa8] sm:$0xff] }
 0x140   :  { %2675 = vst [vmem:[%s3287_s6 + $0x48] sm:$0xff] %v2595_v29   ;;  %v1709_v33 = vmax.f32 %v1280_v32, %v1615_v28 }
 0x142   :  { %v1762_v44 = vadd.f32 %v2894_v56, %v1709_v33 }
 0x144   :  { %v1811_v47 = vmax.f32 %v1762_v44, 0.0  ;;  %v2497_v44 = vld [vmem:[%s3283_s1 + $0xb0] sm:$0xff] }
 0x145   :  { %v1188_v35 = vpop.f32.mrf.mxu2  ;;  %v1617_v36 = vpop.f32.mrf.mxu3 }
 0x146   :  { %v1281_v39 = vmax.f32 %v852_v34, %v1188_v35  ;;  %v382_v40 = vpop.f32.mrf.mxu0  ;;  %v762_v41 = vpop.f32.mrf.mxu1 }
 0x147   :  { %v853_v49 = vmax.f32 %v382_v40, %v762_v41 }
 0x148   :  { %v1710_v45 = vmax.f32 %v1281_v39, %v1617_v36 }
 0x149   :  { %2077 = vmatmul.msk.bf16.gmra.mxu0 %vm235_vm2, %v2470_v37  ;;  %2198 = vmatmul.msk.bf16.gmra.mxu1 %vm235_vm2, %v2494_v38 }
 0x14a   :  { %v1763_v46 = vadd.f32 %v2894_v56, %v1710_v45  ;;  %2319 = vmatmul.msk.bf16.gmra.mxu2 %vm235_vm2, %v2518_v42  ;;  %2440 = vmatmul.msk.bf16.gmra.mxu3 %vm235_vm2, %v2542_v43  ;;  %v2473_v43 = vld [vmem:[%s3282_s0 + $0xb0] sm:$0xff] }
 0x14c   :  { %v1812_v48 = vmax.f32 %v1763_v46, 0.0 }
 0x14d   :  { %v1191_v50 = vpop.f32.mrf.mxu2  ;;  %v1620_v51 = vpop.f32.mrf.mxu3 }
 0x14e   :  { %v2600_v52 = vpack.c.bf16 %v1812_v48, %v1811_v47  ;;  %v384_v53 = vpop.f32.mrf.mxu0  ;;  %v764_v54 = vpop.f32.mrf.mxu1  ;;  %v1282_v55 = vmax.f32 %v853_v49, %v1191_v50  ;;  %v2521_v48 = vld [vmem:[%s3284_s2 + $0xb0] sm:$0xff] }
 0x14f   :  { %v854_v58 = vmax.f32 %v384_v53, %v764_v54  ;;  %v2545_v49 = vld [vmem:[%s3285_s3 + $0xb0] sm:$0xff] }
 0x150   :  { %2676 = vst [vmem:[%s3287_s6 + $0x50] sm:$0xff] %v2600_v52   ;;  %v1711_v57 = vmax.f32 %v1282_v55, %v1620_v51 }
 0x152   :  { %v1764_v4 = vadd.f32 %v2894_v56, %v1711_v57 }
 0x154   :  { %v1813_v7 = vmax.f32 %v1764_v4, 0.0  ;;  %v2498_v4 = vld [vmem:[%s3283_s1 + $0xb8] sm:$0xff] }
 0x155   :  { %v1193_v59 = vpop.f32.mrf.mxu2  ;;  %v1622_v60 = vpop.f32.mrf.mxu3 }
 0x156   :  { %v1283_v63 = vmax.f32 %v854_v58, %v1193_v59  ;;  %v387_v0 = vpop.f32.mrf.mxu0  ;;  %v767_v1 = vpop.f32.mrf.mxu1 }
 0x157   :  { %v855_v9 = vmax.f32 %v387_v0, %v767_v1 }
 0x158   :  { %v1712_v5 = vmax.f32 %v1283_v63, %v1622_v60 }
 0x159   :  { %2078 = vmatmul.msk.bf16.gmra.mxu0 %vm235_vm2, %v2471_v61  ;;  %2199 = vmatmul.msk.bf16.gmra.mxu1 %vm235_vm2, %v2495_v62 }
 0x15a   :  { %v1765_v6 = vadd.f32 %v2894_v56, %v1712_v5  ;;  %2320 = vmatmul.msk.bf16.gmra.mxu2 %vm235_vm2, %v2519_v2  ;;  %2441 = vmatmul.msk.bf16.gmra.mxu3 %vm235_vm2, %v2543_v3  ;;  %v2474_v3 = vld [vmem:[%s3282_s0 + $0xb8] sm:$0xff] }
 0x15c   :  { %v1814_v8 = vmax.f32 %v1765_v6, 0.0 }
 0x15d   :  { %v1196_v10 = vpop.f32.mrf.mxu2  ;;  %v1625_v11 = vpop.f32.mrf.mxu3 }
 0x15e   :  { %v2605_v12 = vpack.c.bf16 %v1814_v8, %v1813_v7  ;;  %v389_v13 = vpop.f32.mrf.mxu0  ;;  %v769_v14 = vpop.f32.mrf.mxu1  ;;  %v1284_v15 = vmax.f32 %v855_v9, %v1196_v10  ;;  %v2522_v8 = vld [vmem:[%s3284_s2 + $0xb8] sm:$0xff] }
 0x15f   :  { %v856_v17 = vmax.f32 %v389_v13, %v769_v14  ;;  %v2546_v9 = vld [vmem:[%s3285_s3 + $0xb8] sm:$0xff] }
 0x160   :  { %2677 = vst [vmem:[%s3287_s6 + $0x58] sm:$0xff] %v2605_v12   ;;  %v1713_v16 = vmax.f32 %v1284_v15, %v1625_v11 }
 0x162   :  { %v1766_v27 = vadd.f32 %v2894_v56, %v1713_v16 }
 0x164   :  { %v1815_v30 = vmax.f32 %v1766_v27, 0.0 }
 0x165   :  { %v1198_v18 = vpop.f32.mrf.mxu2  ;;  %v1627_v19 = vpop.f32.mrf.mxu3 }
 0x166   :  { %v1285_v22 = vmax.f32 %v856_v17, %v1198_v18  ;;  %v392_v23 = vpop.f32.mrf.mxu0  ;;  %v772_v24 = vpop.f32.mrf.mxu1 }
 0x167   :  { %v857_v32 = vmax.f32 %v392_v23, %v772_v24  ;;  %v928_v23 = vld [vmem:[%s3284_s2 + $0xc0] sm:$0xf] }
 0x168   :  { %v1714_v28 = vmax.f32 %v1285_v22, %v1627_v19  ;;  %v499_v22 = vld [vmem:[%s3283_s1 + $0xc0] sm:$0xf] }
 0x169   :  { %2079 = vmatmul.msk.bf16.gmra.mxu0 %vm235_vm2, %v2472_v20  ;;  %2200 = vmatmul.msk.bf16.gmra.mxu1 %vm235_vm2, %v2496_v21  ;;  %v82_v21 = vld [vmem:[%s3282_s0 + $0xc0] sm:$0xf]  ;;  %v597_v27 = vunpack.c.l.b16 %v499_v22 }
 0x16a   :  { %v1767_v29 = vadd.f32 %v2894_v56, %v1714_v28  ;;  %2321 = vmatmul.msk.bf16.gmra.mxu2 %vm235_vm2, %v2520_v25  ;;  %2442 = vmatmul.msk.bf16.gmra.mxu3 %vm235_vm2, %v2544_v26  ;;  %v1357_v24 = vld [vmem:[%s3285_s3 + $0xc0] sm:$0xf]  ;;  %v180_v26 = vunpack.c.l.b16 %v82_v21  ;;  %v1026_v28 = vunpack.c.l.b16 %v928_v23 }
 0x16c   :  { %v1816_v31 = vmax.f32 %v1767_v29, 0.0  ;;  %v1455_v29 = vunpack.c.l.b16 %v1357_v24 }
 0x16d   :  { %v1201_v33 = vpop.f32.mrf.mxu2  ;;  %v1630_v34 = vpop.f32.mrf.mxu3 }
 0x16e   :  { %v2610_v35 = vpack.c.bf16 %v1816_v31, %v1815_v30  ;;  %v394_v36 = vpop.f32.mrf.mxu0  ;;  %v774_v37 = vpop.f32.mrf.mxu1  ;;  %v1286_v38 = vmax.f32 %v857_v32, %v1201_v33 }
 0x16f   :  { %v858_v40 = vmax.f32 %v394_v36, %v774_v37 }
 0x170   :  { %2678 = vst [vmem:[%s3287_s6 + $0x60] sm:$0xff] %v2610_v35   ;;  %v1715_v39 = vmax.f32 %v1286_v38, %v1630_v34  ;;  %v205_v34 = vpack.c.b16 %v180_v26, %v180_v26  ;;  %v622_v35 = vpack.c.b16 %v597_v27, %v597_v27 }
 0x172   :  { %v1768_v50 = vadd.f32 %v2894_v56, %v1715_v39  ;;  %v1051_v39 = vpack.c.b16 %v1026_v28, %v1026_v28 }
 0x174   :  { %v1817_v53 = vmax.f32 %v1768_v50, 0.0 }
 0x175   :  { %v1203_v41 = vpop.f32.mrf.mxu2  ;;  %v1632_v42 = vpop.f32.mrf.mxu3 }
 0x176   :  { %v1287_v45 = vmax.f32 %v858_v40, %v1203_v41  ;;  %v397_v46 = vpop.f32.mrf.mxu0  ;;  %v777_v47 = vpop.f32.mrf.mxu1  ;;  %v1480_v40 = vpack.c.b16 %v1455_v29, %v1455_v29 }
 0x177   :  { %v859_v55 = vmax.f32 %v397_v46, %v777_v47 }
 0x178   :  { %v1716_v51 = vmax.f32 %v1287_v45, %v1632_v42 }
 0x179   :  { %2080 = vmatmul.msk.bf16.gmra.mxu0 %vm235_vm2, %v2473_v43  ;;  %2201 = vmatmul.msk.bf16.gmra.mxu1 %vm235_vm2, %v2497_v44 }
 0x17a   :  { %v1769_v52 = vadd.f32 %v2894_v56, %v1716_v51  ;;  %2322 = vmatmul.msk.bf16.gmra.mxu2 %vm235_vm2, %v2521_v48  ;;  %2443 = vmatmul.msk.bf16.gmra.mxu3 %vm235_vm2, %v2545_v49 }
 0x17c   :  { %v1818_v54 = vmax.f32 %v1769_v52, 0.0 }
 0x17d   :  { %v1206_v57 = vpop.f32.mrf.mxu2  ;;  %v1635_v58 = vpop.f32.mrf.mxu3 }
 0x17e   :  { %v2615_v59 = vpack.c.bf16 %v1818_v54, %v1817_v53  ;;  %v399_v60 = vpop.f32.mrf.mxu0  ;;  %v779_v61 = vpop.f32.mrf.mxu1  ;;  %v1288_v62 = vmax.f32 %v859_v55, %v1206_v57 }
 0x17f   :  { %v860_v0 = vmax.f32 %v399_v60, %v779_v61 }
 0x180   :  { %2679 = vst [vmem:[%s3287_s6 + $0x68] sm:$0xff] %v2615_v59   ;;  %v1717_v63 = vmax.f32 %v1288_v62, %v1635_v58 }
 0x182   :  { %v1770_v10 = vadd.f32 %v2894_v56, %v1717_v63 }
 0x184   :  { %v1819_v13 = vmax.f32 %v1770_v10, 0.0 }
 0x185   :  { %v1208_v1 = vpop.f32.mrf.mxu2  ;;  %v1637_v2 = vpop.f32.mrf.mxu3 }
 0x186   :  { %v1289_v5 = vmax.f32 %v860_v0, %v1208_v1  ;;  %v402_v6 = vpop.f32.mrf.mxu0  ;;  %v782_v7 = vpop.f32.mrf.mxu1 }
 0x187   :  { %v861_v15 = vmax.f32 %v402_v6, %v782_v7 }
 0x188   :  { %v1718_v11 = vmax.f32 %v1289_v5, %v1637_v2 }
 0x189   :  { %2081 = vmatmul.msk.bf16.gmra.mxu0 %vm235_vm2, %v2474_v3  ;;  %2202 = vmatmul.msk.bf16.gmra.mxu1 %vm235_vm2, %v2498_v4 }
 0x18a   :  { %v1771_v12 = vadd.f32 %v2894_v56, %v1718_v11  ;;  %2323 = vmatmul.msk.bf16.gmra.mxu2 %vm235_vm2, %v2522_v8  ;;  %2444 = vmatmul.msk.bf16.gmra.mxu3 %vm235_vm2, %v2546_v9 }
 0x18c   :  { %v1820_v14 = vmax.f32 %v1771_v12, 0.0 }
 0x18d   :  { %v1211_v16 = vpop.f32.mrf.mxu2  ;;  %v1640_v17 = vpop.f32.mrf.mxu3 }
 0x18e   :  { %v2620_v18 = vpack.c.bf16 %v1820_v14, %v1819_v13  ;;  %v404_v19 = vpop.f32.mrf.mxu0  ;;  %v784_v20 = vpop.f32.mrf.mxu1  ;;  %v1290_v25 = vmax.f32 %v861_v15, %v1211_v16 }
 0x18f   :  { %v862_v31 = vmax.f32 %v404_v19, %v784_v20 }
 0x190   :  { %2680 = vst [vmem:[%s3287_s6 + $0x70] sm:$0xff] %v2620_v18   ;;  %v1719_v30 = vmax.f32 %v1290_v25, %v1640_v17 }
 0x192   :  { %v1772_v41 = vadd.f32 %v2894_v56, %v1719_v30 }
 0x194   :  { %v1821_v44 = vmax.f32 %v1772_v41, 0.0 }
 0x195   :  { %v1213_v32 = vpop.f32.mrf.mxu2  ;;  %v1642_v33 = vpop.f32.mrf.mxu3 }
 0x196   :  { %v1291_v36 = vmax.f32 %v862_v31, %v1213_v32  ;;  %v407_v37 = vpop.f32.mrf.mxu0  ;;  %v787_v38 = vpop.f32.mrf.mxu1 }
 0x197   :  { %v863_v46 = vmax.f32 %v407_v37, %v787_v38 }
 0x198   :  { %v1720_v42 = vmax.f32 %v1291_v36, %v1642_v33 }
 0x199   :  { %2082 = vmatmul.msk.bf16.gmra.mxu0 %vm235_vm2, %v205_v34  ;;  %2203 = vmatmul.msk.bf16.gmra.mxu1 %vm235_vm2, %v622_v35 }
 0x19a   :  { %v1773_v43 = vadd.f32 %v2894_v56, %v1720_v42  ;;  %2324 = vmatmul.msk.bf16.gmra.mxu2 %vm235_vm2, %v1051_v39  ;;  %2445 = vmatmul.msk.bf16.gmra.mxu3 %vm235_vm2, %v1480_v40 }
 0x19c   :  { %v1822_v45 = vmax.f32 %v1773_v43, 0.0 }
 0x19d   :  { %v1216_v47 = vpop.f32.mrf.mxu2  ;;  %v1645_v48 = vpop.f32.mrf.mxu3 }
 0x19e   :  { %v2625_v49 = vpack.c.bf16 %v1822_v45, %v1821_v44  ;;  %v409_v50 = vpop.f32.mrf.mxu0  ;;  %v789_v51 = vpop.f32.mrf.mxu1  ;;  %v1292_v52 = vmax.f32 %v863_v46, %v1216_v47 }
 0x19f   :  { %v864_v54 = vmax.f32 %v409_v50, %v789_v51 }
 0x1a0   :  { %2681 = vst [vmem:[%s3287_s6 + $0x78] sm:$0xff] %v2625_v49   ;;  %v1721_v53 = vmax.f32 %v1292_v52, %v1645_v48 }
 0x1a2   :  { %v1774_v61 = vadd.f32 %v2894_v56, %v1721_v53  ;;  %v3250_v53 = vld [vmem:[%s3286_s5] ss:$0 sm:$0xff] }
 0x1a4   :  { %v1823_v0 = vmax.f32 %v1774_v61, 0.0 }
 0x1a5   :  { %v1218_v55 = vpop.f32.mrf.mxu2  ;;  %v1647_v57 = vpop.f32.mrf.mxu3 }
 0x1a6   :  { %v1293_v58 = vmax.f32 %v864_v54, %v1218_v55  ;;  %v412_v59 = vpop.f32.mrf.mxu0  ;;  %v792_v60 = vpop.f32.mrf.mxu1 }
 0x1a7   :  { %v865_v2 = vmax.f32 %v412_v59, %v792_v60 }
 0x1a8   :  { %v1722_v62 = vmax.f32 %v1293_v58, %v1647_v57 }
 0x1aa   :  { %v1775_v63 = vadd.f32 %v2894_v56, %v1722_v62 }
 0x1ac   :  { %v1824_v1 = vmax.f32 %v1775_v63, 0.0 }
 0x1ad   :  { %v1221_v3 = vpop.f32.mrf.mxu2  ;;  %v1650_v4 = vpop.f32.mrf.mxu3 }
 0x1ae   :  { %v2630_v5 = vpack.c.bf16 %v1824_v1, %v1823_v0  ;;  %v414_v6 = vpop.f32.mrf.mxu0  ;;  %v794_v7 = vpop.f32.mrf.mxu1  ;;  %v1294_v8 = vmax.f32 %v865_v2, %v1221_v3 }
 0x1af   :  { %v866_v10 = vmax.f32 %v414_v6, %v794_v7 }
 0x1b0   :  { %2682 = vst [vmem:[%s3287_s6 + $0x80] sm:$0xff] %v2630_v5   ;;  %v1723_v9 = vmax.f32 %v1294_v8, %v1650_v4 }
 0x1b2   :  { %v1776_v16 = vadd.f32 %v2894_v56, %v1723_v9 }
 0x1b4   :  { %v1825_v19 = vmax.f32 %v1776_v16, 0.0 }
 0x1b5   :  { %v1223_v11 = vpop.f32.mrf.mxu2  ;;  %v1652_v12 = vpop.f32.mrf.mxu3 }
 0x1b6   :  { %v1295_v13 = vmax.f32 %v866_v10, %v1223_v11  ;;  %v417_v14 = vpop.f32.mrf.mxu0  ;;  %v797_v15 = vpop.f32.mrf.mxu1 }
 0x1b7   :  { %v867_v21 = vmax.f32 %v417_v14, %v797_v15 }
 0x1b8   :  { %v1724_v17 = vmax.f32 %v1295_v13, %v1652_v12 }
 0x1ba   :  { %v1777_v18 = vadd.f32 %v2894_v56, %v1724_v17 }
 0x1bc   :  { %v1826_v20 = vmax.f32 %v1777_v18, 0.0 }
 0x1bd   :  { %v1226_v22 = vpop.f32.mrf.mxu2  ;;  %v1655_v23 = vpop.f32.mrf.mxu3 }
 0x1be   :  { %v2635_v24 = vpack.c.bf16 %v1826_v20, %v1825_v19  ;;  %v419_v25 = vpop.f32.mrf.mxu0  ;;  %v799_v26 = vpop.f32.mrf.mxu1  ;;  %v1296_v27 = vmax.f32 %v867_v21, %v1226_v22 }
 0x1bf   :  { %v868_v29 = vmax.f32 %v419_v25, %v799_v26 }
 0x1c0   :  { %2683 = vst [vmem:[%s3287_s6 + $0x88] sm:$0xff] %v2635_v24   ;;  %v1725_v28 = vmax.f32 %v1296_v27, %v1655_v23 }
 0x1c2   :  { %v1778_v35 = vadd.f32 %v2894_v56, %v1725_v28 }
 0x1c4   :  { %v1827_v38 = vmax.f32 %v1778_v35, 0.0 }
 0x1c5   :  { %v1228_v30 = vpop.f32.mrf.mxu2  ;;  %v1657_v31 = vpop.f32.mrf.mxu3 }
 0x1c6   :  { %v1297_v32 = vmax.f32 %v868_v29, %v1228_v30  ;;  %v422_v33 = vpop.f32.mrf.mxu0  ;;  %v802_v34 = vpop.f32.mrf.mxu1 }
 0x1c7   :  { %v869_v40 = vmax.f32 %v422_v33, %v802_v34 }
 0x1c8   :  { %v1726_v36 = vmax.f32 %v1297_v32, %v1657_v31 }
 0x1ca   :  { %v1779_v37 = vadd.f32 %v2894_v56, %v1726_v36 }
 0x1cc   :  { %v1828_v39 = vmax.f32 %v1779_v37, 0.0 }
 0x1cd   :  { %v1231_v41 = vpop.f32.mrf.mxu2  ;;  %v1660_v42 = vpop.f32.mrf.mxu3 }
 0x1ce   :  { %v2640_v43 = vpack.c.bf16 %v1828_v39, %v1827_v38  ;;  %v424_v44 = vpop.f32.mrf.mxu0  ;;  %v804_v45 = vpop.f32.mrf.mxu1  ;;  %v1298_v46 = vmax.f32 %v869_v40, %v1231_v41 }
 0x1cf   :  { %v870_v48 = vmax.f32 %v424_v44, %v804_v45 }
 0x1d0   :  { %2684 = vst [vmem:[%s3287_s6 + $0x90] sm:$0xff] %v2640_v43   ;;  %v1727_v47 = vmax.f32 %v1298_v46, %v1660_v42 }
 0x1d2   :  { %v1780_v54 = vadd.f32 %v3250_v53, %v1727_v47 }
 0x1d4   :  { %v1829_v58 = vmax.f32 %v1780_v54, 0.0 }
 0x1d5   :  { %v1233_v49 = vpop.f32.mrf.mxu2  ;;  %v1662_v50 = vpop.f32.mrf.mxu3 }
 0x1d6   :  { %v1299_v51 = vmax.f32 %v870_v48, %v1233_v49  ;;  %v427_v52 = vpop.f32.mrf.mxu0  ;;  %v807_v56 = vpop.f32.mrf.mxu1 }
 0x1d7   :  { %v871_v60 = vmax.f32 %v427_v52, %v807_v56 }
 0x1d8   :  { %v1728_v55 = vmax.f32 %v1299_v51, %v1662_v50 }
 0x1da   :  { %v1781_v57 = vadd.f32 %v3250_v53, %v1728_v55 }
 0x1dc   :  { %v1830_v59 = vmax.f32 %v1781_v57, 0.0 }
 0x1dd   :  { %v1236_v61 = vpop.f32.mrf.mxu2  ;;  %v1665_v62 = vpop.f32.mrf.mxu3 }
 0x1de   :  { %v2645_v63 = vpack.c.bf16 %v1830_v59, %v1829_v58  ;;  %v429_v0 = vpop.f32.mrf.mxu0  ;;  %v809_v1 = vpop.f32.mrf.mxu1  ;;  %v1300_v2 = vmax.f32 %v871_v60, %v1236_v61 }
 0x1df   :  { %v872_v4 = vmax.f32 %v429_v0, %v809_v1 }
 0x1e0   :  { %2685 = vst [vmem:[%s3287_s6 + $0x98] sm:$0xff] %v2645_v63   ;;  %v1729_v3 = vmax.f32 %v1300_v2, %v1665_v62 }
 0x1e2   :  { %v1782_v10 = vadd.f32 %v3250_v53, %v1729_v3 }
 0x1e4   :  { %v1831_v13 = vmax.f32 %v1782_v10, 0.0 }
 0x1e5   :  { %v1238_v5 = vpop.f32.mrf.mxu2  ;;  %v1667_v6 = vpop.f32.mrf.mxu3 }
 0x1e6   :  { %v1301_v7 = vmax.f32 %v872_v4, %v1238_v5  ;;  %v432_v8 = vpop.f32.mrf.mxu0  ;;  %v812_v9 = vpop.f32.mrf.mxu1 }
 0x1e7   :  { %v873_v15 = vmax.f32 %v432_v8, %v812_v9 }
 0x1e8   :  { %v1730_v11 = vmax.f32 %v1301_v7, %v1667_v6 }
 0x1ea   :  { %v1783_v12 = vadd.f32 %v3250_v53, %v1730_v11 }
 0x1ec   :  { %v1832_v14 = vmax.f32 %v1783_v12, 0.0 }
 0x1ed   :  { %v1241_v16 = vpop.f32.mrf.mxu2  ;;  %v1670_v17 = vpop.f32.mrf.mxu3 }
 0x1ee   :  { %v2650_v18 = vpack.c.bf16 %v1832_v14, %v1831_v13  ;;  %v434_v19 = vpop.f32.mrf.mxu0  ;;  %v814_v20 = vpop.f32.mrf.mxu1  ;;  %v1302_v21 = vmax.f32 %v873_v15, %v1241_v16 }
 0x1ef   :  { %v874_v23 = vmax.f32 %v434_v19, %v814_v20 }
 0x1f0   :  { %2686 = vst [vmem:[%s3287_s6 + $0xa0] sm:$0xff] %v2650_v18   ;;  %v1731_v22 = vmax.f32 %v1302_v21, %v1670_v17 }
 0x1f2   :  { %v1784_v29 = vadd.f32 %v3250_v53, %v1731_v22 }
 0x1f4   :  { %v1833_v32 = vmax.f32 %v1784_v29, 0.0 }
 0x1f5   :  { %v1243_v24 = vpop.f32.mrf.mxu2  ;;  %v1672_v25 = vpop.f32.mrf.mxu3 }
 0x1f6   :  { %v1303_v26 = vmax.f32 %v874_v23, %v1243_v24  ;;  %v437_v27 = vpop.f32.mrf.mxu0  ;;  %v817_v28 = vpop.f32.mrf.mxu1 }
 0x1f7   :  { %v875_v34 = vmax.f32 %v437_v27, %v817_v28 }
 0x1f8   :  { %v1732_v30 = vmax.f32 %v1303_v26, %v1672_v25 }
 0x1fa   :  { %v1785_v31 = vadd.f32 %v3250_v53, %v1732_v30 }
 0x1fc   :  { %v1834_v33 = vmax.f32 %v1785_v31, 0.0 }
 0x1fd   :  { %v1246_v35 = vpop.f32.mrf.mxu2  ;;  %v1675_v36 = vpop.f32.mrf.mxu3 }
 0x1fe   :  { %v2655_v37 = vpack.c.bf16 %v1834_v33, %v1833_v32  ;;  %v439_v38 = vpop.f32.mrf.mxu0  ;;  %v819_v39 = vpop.f32.mrf.mxu1  ;;  %v1304_v40 = vmax.f32 %v875_v34, %v1246_v35 }
 0x1ff   :  { %v876_v42 = vmax.f32 %v439_v38, %v819_v39 }
 0x200   :  { %2687 = vst [vmem:[%s3287_s6 + $0xa8] sm:$0xff] %v2655_v37   ;;  %v1733_v41 = vmax.f32 %v1304_v40, %v1675_v36 }
 0x202   :  { %v1786_v48 = vadd.f32 %v3250_v53, %v1733_v41 }
 0x204   :  { %v1835_v51 = vmax.f32 %v1786_v48, 0.0 }
 0x205   :  { %v1248_v43 = vpop.f32.mrf.mxu2  ;;  %v1677_v44 = vpop.f32.mrf.mxu3 }
 0x206   :  { %v1305_v45 = vmax.f32 %v876_v42, %v1248_v43  ;;  %v442_v46 = vpop.f32.mrf.mxu0  ;;  %v822_v47 = vpop.f32.mrf.mxu1 }
 0x207   :  { %v877_v56 = vmax.f32 %v442_v46, %v822_v47 }
 0x208   :  { %v1734_v49 = vmax.f32 %v1305_v45, %v1677_v44 }
 0x20a   :  { %v1787_v50 = vadd.f32 %v3250_v53, %v1734_v49 }
 0x20c   :  { %v1836_v52 = vmax.f32 %v1787_v50, 0.0 }
 0x20d   :  { %v1251_v54 = vpop.f32.mrf.mxu2  ;;  %v1680_v55 = vpop.f32.mrf.mxu3 }
 0x20e   :  { %v2660_v57 = vpack.c.bf16 %v1836_v52, %v1835_v51  ;;  %v444_v58 = vpop.f32.mrf.mxu0  ;;  %v824_v59 = vpop.f32.mrf.mxu1  ;;  %v1306_v60 = vmax.f32 %v877_v56, %v1251_v54 }
 0x20f   :  { %v878_v62 = vmax.f32 %v444_v58, %v824_v59 }
 0x210   :  { %2688 = vst [vmem:[%s3287_s6 + $0xb0] sm:$0xff] %v2660_v57   ;;  %v1735_v61 = vmax.f32 %v1306_v60, %v1680_v55 }
 0x212   :  { %v1788_v4 = vadd.f32 %v3250_v53, %v1735_v61 }
 0x214   :  { %v1837_v8 = vmax.f32 %v1788_v4, 0.0 }
 0x215   :  { %v1253_v63 = vpop.f32.mrf.mxu2  ;;  %v1682_v0 = vpop.f32.mrf.mxu3 }
 0x216   :  { %v1307_v1 = vmax.f32 %v878_v62, %v1253_v63  ;;  %v447_v2 = vpop.f32.mrf.mxu0  ;;  %v827_v3 = vpop.f32.mrf.mxu1 }
 0x217   :  { %v879_v7 = vmax.f32 %v447_v2, %v827_v3 }
 0x218   :  { %v1736_v5 = vmax.f32 %v1307_v1, %v1682_v0 }
 0x21a   :  { %v1789_v6 = vadd.f32 %v3250_v53, %v1736_v5 }
 0x21c   :  { %v1838_v9 = vmax.f32 %v1789_v6, 0.0 }
 0x21d   :  { %v1256_v10 = vpop.f32.mrf.mxu2  ;;  %v1685_v11 = vpop.f32.mrf.mxu3 }
 0x21e   :  { %v2665_v12 = vpack.c.bf16 %v1838_v9, %v1837_v8  ;;  %v1308_v13 = vmax.f32 %v879_v7, %v1256_v10  ;;  %v449_v14 = vpop.f32.mrf.mxu0  ;;  %v829_v15 = vpop.f32.mrf.mxu1 }
 0x220   :  { %2689 = vst [vmem:[%s3287_s6 + $0xb8] sm:$0xff] %v2665_v12   ;;  %v1737_v16 = vmax.f32 %v1308_v13, %v1685_v11 }
 0x222   :  { %v1790_v17 = vadd.f32 %v3250_v53, %v1737_v16 }
 0x224   :  { %v1839_v18 = vmax.f32 %v1790_v17, 0.0 }
 0x225   :  { %v1258_v19 = vpop.f32.mrf.mxu2  ;;  %v1687_v20 = vpop.f32.mrf.mxu3 }
 0x226   :  { %v1888_v21 = vpack.c.bf16 %v1839_v18, %v1839_v18 }
 0x228   :  { %1937 = vst [vmem:[%s3287_s6 + $0xc0] sm:$0xf] %v1888_v21 }

// kernel: lenet_dfa_forward.4
= control target key start
LH: loop header
LB: loop body
LE: loop exit
PB: predicated region body
PF: predicated region fallthrough
CT: control target
= control target key end

     0   :  { %vm153_vm0 = vcmask 1042432   ;;  %vm140_vm1 = vcmask 179200   ;;  %s1105_s4 = inlined_call_operand.vmem [shape: bf16[150,128], index: 4, kind: input, shape index: {}]   ;;  %s1106_s1 = inlined_call_operand.vmem [shape: bf16[50,150], index: 1, kind: input, shape index: {}]   ;;  %s1107_s0 = inlined_call_operand.vmem [shape: bf16[50,150], index: 0, kind: input, shape index: {}]   ;;  %s1108_s2 = inlined_call_operand.vmem [shape: bf16[50,150], index: 2, kind: input, shape index: {}]   ;;  %s1109_s3 = inlined_call_operand.vmem [shape: bf16[50,150], index: 3, kind: input, shape index: {}]   ;;  %s1110_s5 = inlined_call_operand.vmem [shape: f32[1,128], index: 5, kind: input, shape index: {}]   ;;  %s1111_s6 = inlined_call_operand.vmem [shape: bf16[50,128], index: 6, kind: output, shape index: {}]  }
   0x1   :  { %v831_v0 = vld [vmem:[%s1105_s4 + $0x38] sm:$0xff]  ;;  %v42_v1 = vld [vmem:[%s1105_s4 + $0x48] sm:$0x7]  ;;  %v841_v3 = vld [vmem:[%s1105_s4 + $0x30] sm:$0xff] }
   0x2   :  { %v120_v2 = vunpack.c.l.b16 %v42_v1  ;;  %157 = vmatpush.bf16.msra.mxu0 %v831_v0  ;;  %265 = vmatpush.bf16.msra.mxu2 %v831_v0  ;;  %v750_v6 = vld [vmem:[%s1105_s4 + $0x40] sm:$0xff]  ;;  %v850_v7 = vld [vmem:[%s1105_s4 + $0x28] sm:$0xff]  ;;  %v745_v15 = vld [vmem:[%s1105_s4 + $0x18] sm:$0xff] }
   0x3   :  { %v757_v8 = vld [vmem:[%s1106_s1 + $0x4] sm:$0xf]  ;;  %v662_v9 = vld [vmem:[%s1106_s1 + $0x8] sm:$0xf0]  ;;  %v744_v16 = vld [vmem:[%s1105_s4 + $0x10] sm:$0xff] }
   0x4   :  { %v130_v4 = vpack.c.b16 %v120_v2, %v120_v2  ;;  %v751_v10 = vld [vmem:[%s1107_s0 + $0x4] sm:$0xf]  ;;  %v598_v11 = vld [vmem:[%s1107_s0 + $0x8] sm:$0xf0]  ;;  %v665_v12 = vor.u32 %v757_v8, %v662_v9  ;;  %v759_v18 = vld [vmem:[%s1106_s1 + $0x14] sm:$0xf] }
   0x5   :  { %v746_v13 = vld [vmem:[%s1105_s4 + $0x20] sm:$0xff]  ;;  %v601_v14 = vor.u32 %v751_v10, %v598_v11  ;;  %v743_v17 = vld [vmem:[%s1105_s4 + $0x8] sm:$0xff]  ;;  %v670_v19 = vld [vmem:[%s1106_s1 + $0x18] sm:$0xf0] }
   0x6   :  { %v155_v5 = vsel %vm153_vm0, %v130_v4, 0  ;;  %158 = vmatpush.bf16.msra.mxu0 %v841_v3  ;;  %266 = vmatpush.bf16.msra.mxu2 %v841_v3  ;;  %v753_v20 = vld [vmem:[%s1107_s0 + $0x14] sm:$0xf]  ;;  %v606_v21 = vld [vmem:[%s1107_s0 + $0x18] sm:$0xf0]  ;;  %v673_v22 = vor.u32 %v759_v18, %v670_v19  ;;  %v742_v23 = vld [vmem:[%s1105_s4] sm:$0xff] }
   0x7   :  { %299 = vmatpush.bf16.msra.mxu3 %v155_v5  ;;  %191 = vmatpush.bf16.msra.mxu1 %v155_v5  ;;  %v596_v24 = vld [vmem:[%s1107_s0] sm:$0xf]  ;;  %v752_v25 = vld [vmem:[%s1107_s0 + $0x4] sm:$0xf0]  ;;  %v609_v26 = vor.u32 %v753_v20, %v606_v21  ;;  %v761_v31 = vld [vmem:[%s1106_s1 + $0x24] sm:$0xf] }
   0x8   :  { %v660_v27 = vld [vmem:[%s1106_s1] sm:$0xf]  ;;  %v758_v28 = vld [vmem:[%s1106_s1 + $0x4] sm:$0xf0]  ;;  %v597_v29 = vor.u32 %v752_v25, %v596_v24  ;;  %v678_v32 = vld [vmem:[%s1106_s1 + $0x28] sm:$0xf0] }
   0x9   :  { %v661_v30 = vor.u32 %v758_v28, %v660_v27  ;;  %v755_v33 = vld [vmem:[%s1107_s0 + $0x24] sm:$0xf]  ;;  %v614_v34 = vld [vmem:[%s1107_s0 + $0x28] sm:$0xf0]  ;;  %v681_v35 = vor.u32 %v761_v31, %v678_v32  ;;  %v604_v36 = vld [vmem:[%s1107_s0 + $0x10] sm:$0xf] }
   0xa   :  { %159 = vmatpush.bf16.msra.mxu0 %v850_v7  ;;  %267 = vmatpush.bf16.msra.mxu2 %v850_v7  ;;  %v754_v37 = vld [vmem:[%s1107_s0 + $0x14] sm:$0xf0]  ;;  %v617_v38 = vor.u32 %v755_v33, %v614_v34  ;;  %v668_v39 = vld [vmem:[%s1106_s1 + $0x10] sm:$0xf]  ;;  %v612_v48 = vld [vmem:[%s1107_s0 + $0x20] sm:$0xf] }
   0xb   :  { %300 = vmatpush.bf16.msra.mxu3 %v750_v6  ;;  %192 = vmatpush.bf16.msra.mxu1 %v750_v6  ;;  %v760_v40 = vld [vmem:[%s1106_s1 + $0x14] sm:$0xf0]  ;;  %v605_v41 = vor.u32 %v754_v37, %v604_v36  ;;  %v219_v43 = vld [vmem:[%s1106_s1 + $0x30] sm:$0x11]  ;;  %v756_v49 = vld [vmem:[%s1107_s0 + $0x24] sm:$0xf0] }
   0xc   :  { %v669_v42 = vor.u32 %v760_v40, %v668_v39  ;;  %v49_v44 = vld [vmem:[%s1107_s0 + $0x30] sm:$0x11]  ;;  %v240_v45 = vunpack.c.h.b16 %v219_v43  ;;  %v676_v51 = vld [vmem:[%s1106_s1 + $0x20] sm:$0xf]  ;;  %v762_v52 = vld [vmem:[%s1106_s1 + $0x24] sm:$0xf0]  ;;  %v613_v53 = vor.u32 %v756_v49, %v612_v48  ;;  %v239_v61 = vunpack.c.l.b16 %v219_v43 }
   0xd   :  { %v70_v46 = vunpack.c.h.b16 %v49_v44  ;;  %v677_v54 = vor.u32 %v762_v52, %v676_v51  ;;  %v763_v55 = vld [vmem:[%s1108_s2 + $0x4] sm:$0xf]  ;;  %v690_v56 = vld [vmem:[%s1108_s2 + $0x8] sm:$0xf0]  ;;  %v688_v57 = vld [vmem:[%s1108_s2] sm:$0xf]  ;;  %v69_v60 = vunpack.c.l.b16 %v49_v44 }
   0xe   :  { %682 = vmatmul.msk.bf16.vlgmr.msra.gmra.mxu3 %vm140_vm1, %v665_v12  ;;  %160 = vmatpush.bf16.msra.mxu0 %v746_v13  ;;  %v248_v47 = vpack.c.b16 %v240_v45, %v240_v45  ;;  %v764_v58 = vld [vmem:[%s1108_s2 + $0x4] sm:$0xf0]  ;;  %v693_v59 = vor.u32 %v763_v55, %v690_v56  ;;  %v765_v1 = vld [vmem:[%s1108_s2 + $0x14] sm:$0xf]  ;;  %v698_v2 = vld [vmem:[%s1108_s2 + $0x18] sm:$0xf0] }
   0xf   :  { %414 = vmatpush.bf16.msrb.mxu3 %v155_v5  ;;  %380 = vmatpush.bf16.msrb.mxu1 %v831_v0  ;;  %v78_v50 = vpack.c.b16 %v70_v46, %v70_v46  ;;  %v689_v62 = vor.u32 %v764_v58, %v688_v57  ;;  %v77_v63 = vpack.c.b16 %v69_v60, %v69_v60  ;;  %v766_v4 = vld [vmem:[%s1108_s2 + $0x14] sm:$0xf0]  ;;  %v769_v9 = vld [vmem:[%s1109_s3 + $0x4] sm:$0xf]  ;;  %v718_v10 = vld [vmem:[%s1109_s3 + $0x8] sm:$0xf0] }
  0x10   :  { %654 = vmatmul.msk.bf16.vlgmr.msra.gmra.mxu1 %vm140_vm1, %v601_v14  ;;  %268 = vmatpush.bf16.msra.mxu2 %v746_v13  ;;  %v721_v12 = vor.u32 %v769_v9, %v718_v10  ;;  %v706_v14 = vld [vmem:[%s1108_s2 + $0x28] sm:$0xf0]  ;;  %v724_v18 = vld [vmem:[%s1109_s3 + $0x10] sm:$0xf]  ;;  %v772_v19 = vld [vmem:[%s1109_s3 + $0x14] sm:$0xf0] }
  0x11   :  { %v771_v21 = vld [vmem:[%s1109_s3 + $0x14] sm:$0xf]  ;;  %v773_v32 = vld [vmem:[%s1109_s3 + $0x24] sm:$0xf]  ;;  %v734_v33 = vld [vmem:[%s1109_s3 + $0x28] sm:$0xf0] }
  0x12   :  { %161 = vmatpush.bf16.msra.mxu0 %v745_v15  ;;  %v334_v25 = vld [vmem:[%s1108_s2 + $0x30] sm:$0x11] }
  0x13   :  { %381 = vmatpush.bf16.msrb.mxu1 %v841_v3  ;;  %415 = vmatpush.bf16.msrb.mxu3 %v750_v6  ;;  %v354_v27 = vunpack.c.l.b16 %v334_v25  ;;  %v449_v36 = vld [vmem:[%s1109_s3 + $0x30] sm:$0x11] }
  0x14   :  { %269 = vmatpush.bf16.msra.mxu2 %v745_v15  ;;  %v469_v37 = vunpack.c.l.b16 %v449_v36 }
  0x15   :  { %v362_v31 = vpack.c.b16 %v354_v27, %v354_v27 }
  0x16   :  { %162 = vmatpush.bf16.msra.mxu0 %v744_v16  ;;  %v477_v40 = vpack.c.b16 %v469_v37, %v469_v37 }
  0x17   :  { %382 = vmatpush.bf16.msrb.mxu1 %v850_v7 }
  0x18   :  { %270 = vmatpush.bf16.msra.mxu2 %v744_v16 }
  0x1a   :  { %163 = vmatpush.bf16.msra.mxu0 %v743_v17 }
  0x1b   :  { %383 = vmatpush.bf16.msrb.mxu1 %v746_v13 }
  0x1c   :  { %271 = vmatpush.bf16.msra.mxu2 %v743_v17 }
  0x1e   :  { %683 = vmatmul.msk.bf16.gmra.mxu3 %vm140_vm1, %v673_v22  ;;  %164 = vmatpush.bf16.msra.mxu0 %v742_v23  ;;  %v726_v22 = vld [vmem:[%s1109_s3 + $0x18] sm:$0xf0] }
  0x1f   :  { %384 = vmatpush.bf16.msrb.mxu1 %v745_v15  ;;  %v729_v24 = vor.u32 %v771_v21, %v726_v22 }
  0x20   :  { %655 = vmatmul.msk.bf16.gmra.mxu1 %vm140_vm1, %v609_v26  ;;  %272 = vmatpush.bf16.msra.mxu2 %v742_v23  ;;  %v355_v26 = vunpack.c.h.b16 %v334_v25 }
  0x21   :  { %165 = vmatmul.bf16.vlgmr.msra.gmra.mxu0 %v597_v29  ;;  %v732_v29 = vld [vmem:[%s1109_s3 + $0x20] sm:$0xf] }
  0x22   :  { %495 = vmatpush.bf16.msrb.mxu0 %v831_v0  ;;  %v247_v0 = vpack.c.b16 %v239_v61, %v239_v61  ;;  %v363_v28 = vpack.c.b16 %v355_v26, %v355_v26 }
  0x23   :  { %385 = vmatpush.bf16.msrb.mxu1 %v744_v16  ;;  %273 = vmatmul.bf16.vlgmr.msra.gmra.mxu2 %v661_v30  ;;  %v774_v30 = vld [vmem:[%s1109_s3 + $0x24] sm:$0xf0] }
  0x24   :  { %529 = vmatpush.bf16.msrb.mxu2 %v155_v5  ;;  %v701_v5 = vor.u32 %v765_v1, %v698_v2  ;;  %v733_v34 = vor.u32 %v774_v30, %v732_v29 }
  0x26   :  { %496 = vmatpush.bf16.msrb.mxu0 %v841_v3  ;;  %v696_v3 = vld [vmem:[%s1108_s2 + $0x10] sm:$0xf] }
  0x27   :  { %386 = vmatpush.bf16.msrb.mxu1 %v743_v17  ;;  %v697_v8 = vor.u32 %v766_v4, %v696_v3 }
  0x28   :  { %530 = vmatpush.bf16.msrb.mxu2 %v750_v6  ;;  %v716_v6 = vld [vmem:[%s1109_s3] sm:$0xf] }
  0x2a   :  { %497 = vmatpush.bf16.msrb.mxu0 %v850_v7  ;;  %v770_v7 = vld [vmem:[%s1109_s3 + $0x4] sm:$0xf0] }
  0x2b   :  { %387 = vmatpush.bf16.msrb.mxu1 %v742_v23  ;;  %v717_v11 = vor.u32 %v770_v7, %v716_v6 }
  0x2e   :  { %498 = vmatpush.bf16.msrb.mxu0 %v746_v13  ;;  %684 = vmatmul.msk.bf16.gmra.mxu3 %vm140_vm1, %v681_v35  ;;  %v767_v13 = vld [vmem:[%s1108_s2 + $0x24] sm:$0xf]  ;;  %v737_v35 = vor.u32 %v773_v32, %v734_v33 }
  0x30   :  { %656 = vmatmul.msk.bf16.gmra.mxu1 %vm140_vm1, %v617_v38  ;;  %v470_v38 = vunpack.c.h.b16 %v449_v36 }
  0x31   :  { %170 = vmatmul.bf16.gmra.mxu0 %v605_v41 }
  0x32   :  { %499 = vmatpush.bf16.msrb.mxu0 %v745_v15  ;;  %v704_v15 = vld [vmem:[%s1108_s2 + $0x20] sm:$0xf]  ;;  %v478_v41 = vpack.c.b16 %v470_v38, %v470_v38 }
  0x33   :  { %278 = vmatmul.bf16.gmra.mxu2 %v669_v42 }
  0x36   :  { %500 = vmatpush.bf16.msrb.mxu0 %v744_v16  ;;  %v768_v16 = vld [vmem:[%s1108_s2 + $0x24] sm:$0xf0] }
  0x37   :  { %v705_v20 = vor.u32 %v768_v16, %v704_v15 }
  0x3a   :  { %501 = vmatpush.bf16.msrb.mxu0 %v743_v17  ;;  %v709_v17 = vor.u32 %v767_v13, %v706_v14 }
  0x3e   :  { %502 = vmatpush.bf16.msrb.mxu0 %v742_v23  ;;  %685 = vmatmul.msk.bf16.gmra.mxu3 %vm140_vm1, %v248_v47  ;;  %v725_v23 = vor.u32 %v772_v19, %v724_v18 }
  0x40   :  { %657 = vmatmul.msk.bf16.gmra.mxu1 %vm140_vm1, %v78_v50 }
  0x41   :  { %175 = vmatmul.bf16.gmra.mxu0 %v613_v53 }
  0x43   :  { %283 = vmatmul.bf16.gmra.mxu2 %v677_v54 }
  0x4e   :  { %710 = vmatmul.msk.bf16.vlgmr.msrb.gmra.mxu3 %vm140_vm1, %v693_v59 }
  0x50   :  { %388 = vmatmul.bf16.vlgmr.msrb.gmra.mxu1 %v689_v62 }
  0x51   :  { %180 = vmatmul.bf16.gmra.mxu0 %v77_v63 }
  0x53   :  { %288 = vmatmul.bf16.gmra.mxu2 %v247_v0 }
  0x5e   :  { %711 = vmatmul.msk.bf16.gmra.mxu3 %vm140_vm1, %v701_v5 }
  0x60   :  { %393 = vmatmul.bf16.gmra.mxu1 %v697_v8 }
  0x61   :  { %503 = vmatmul.bf16.vlgmr.msrb.gmra.mxu0 %v717_v11 }
  0x63   :  { %738 = vmatmul.msk.bf16.vlgmr.msrb.gmra.mxu2 %vm140_vm1, %v721_v12 }
  0x6e   :  { %712 = vmatmul.msk.bf16.gmra.mxu3 %vm140_vm1, %v709_v17 }
  0x70   :  { %398 = vmatmul.bf16.gmra.mxu1 %v705_v20 }
  0x71   :  { %508 = vmatmul.bf16.gmra.mxu0 %v725_v23 }
  0x73   :  { %739 = vmatmul.msk.bf16.gmra.mxu2 %vm140_vm1, %v729_v24 }
  0x7e   :  { %713 = vmatmul.msk.bf16.gmra.mxu3 %vm140_vm1, %v363_v28 }
  0x80   :  { %403 = vmatmul.bf16.gmra.mxu1 %v362_v31 }
  0x81   :  { %513 = vmatmul.bf16.gmra.mxu0 %v733_v34 }
  0x83   :  { %740 = vmatmul.msk.bf16.gmra.mxu2 %vm140_vm1, %v737_v35 }
  0x8d   :  { %v194_v39 = vpop.f32.mrf.mxu1 }
  0x91   :  { %v302_v42 = vpop.f32.mrf.mxu3  ;;  %518 = vmatmul.bf16.gmra.mxu0 %v477_v40 }
  0x93   :  { %741 = vmatmul.msk.bf16.gmra.mxu2 %vm140_vm1, %v478_v41 }
  0x95   :  { %v196_v43 = vpop.f32.mrf.mxu1 }
  0x99   :  { %v304_v44 = vpop.f32.mrf.mxu3 }
  0x9d   :  { %v199_v45 = vpop.f32.mrf.mxu1 }
  0x9e   :  { %v166_v46 = vpop.f32.mrf.mxu0 }
  0x9f   :  { %v195_v47 = vadd.f32 %v194_v39, %v166_v46 }
  0xa1   :  { %v307_v48 = vpop.f32.mrf.mxu3 }
  0xa5   :  { %v201_v49 = vpop.f32.mrf.mxu1 }
  0xa6   :  { %v274_v50 = vpop.f32.mrf.mxu2  ;;  %v168_v52 = vpop.f32.mrf.mxu0 }
  0xa7   :  { %v303_v51 = vadd.f32 %v302_v42, %v274_v50  ;;  %v197_v53 = vadd.f32 %v196_v43, %v168_v52 }
  0xa9   :  { %v321_v54 = vmax.f32 %v195_v47, %v303_v51  ;;  %v309_v55 = vpop.f32.mrf.mxu3  ;;  %v792_v47 = vld [vmem:[%s1110_s5] ss:$0 sm:$0xff] }
  0xad   :  { %v204_v56 = vpop.f32.mrf.mxu1 }
  0xae   :  { %v276_v57 = vpop.f32.mrf.mxu2  ;;  %v171_v59 = vpop.f32.mrf.mxu0 }
  0xaf   :  { %v305_v58 = vadd.f32 %v304_v44, %v276_v57  ;;  %v1048_v60 = vadd.f32 %v199_v45, %v171_v59 }
  0xb1   :  { %v322_v61 = vmax.f32 %v197_v53, %v305_v58  ;;  %v312_v62 = vpop.f32.mrf.mxu3 }
  0xb5   :  { %v206_v63 = vpop.f32.mrf.mxu1 }
  0xb6   :  { %v279_v0 = vpop.f32.mrf.mxu2  ;;  %v173_v2 = vpop.f32.mrf.mxu0 }
  0xb7   :  { %v1050_v1 = vadd.f32 %v307_v48, %v279_v0  ;;  %v1052_v3 = vadd.f32 %v201_v49, %v173_v2 }
  0xb9   :  { %v323_v4 = vmax.f32 %v1048_v60, %v1050_v1  ;;  %v314_v5 = vpop.f32.mrf.mxu3 }
  0xbd   :  { %v209_v6 = vpop.f32.mrf.mxu1 }
  0xbe   :  { %v281_v7 = vpop.f32.mrf.mxu2  ;;  %v176_v9 = vpop.f32.mrf.mxu0 }
  0xbf   :  { %v1056_v8 = vadd.f32 %v309_v55, %v281_v7  ;;  %v1058_v10 = vadd.f32 %v204_v56, %v176_v9 }
  0xc1   :  { %v324_v11 = vmax.f32 %v1052_v3, %v1056_v8  ;;  %v317_v12 = vpop.f32.mrf.mxu3 }
  0xc5   :  { %v211_v13 = vpop.f32.mrf.mxu1 }
  0xc6   :  { %v284_v14 = vpop.f32.mrf.mxu2  ;;  %v178_v16 = vpop.f32.mrf.mxu0 }
  0xc7   :  { %v1062_v15 = vadd.f32 %v312_v62, %v284_v14  ;;  %v1064_v17 = vadd.f32 %v206_v63, %v178_v16 }
  0xc9   :  { %v325_v18 = vmax.f32 %v1058_v10, %v1062_v15  ;;  %v319_v19 = vpop.f32.mrf.mxu3 }
  0xcd   :  { %v389_v20 = vpop.f32.mrf.mxu1 }
  0xce   :  { %v286_v21 = vpop.f32.mrf.mxu2  ;;  %v181_v23 = vpop.f32.mrf.mxu0 }
  0xcf   :  { %v1068_v22 = vadd.f32 %v314_v5, %v286_v21  ;;  %v1070_v24 = vadd.f32 %v209_v6, %v181_v23 }
  0xd1   :  { %v326_v25 = vmax.f32 %v1064_v17, %v1068_v22  ;;  %v417_v26 = vpop.f32.mrf.mxu3 }
  0xd2   :  { %v418_v39 = vadd.f32 %v417_v26, %v389_v20 }
  0xd4   :  { %v436_v43 = vmax.f32 %v321_v54, %v418_v39 }
  0xd5   :  { %v391_v27 = vpop.f32.mrf.mxu1 }
  0xd6   :  { %v289_v28 = vpop.f32.mrf.mxu2  ;;  %v183_v30 = vpop.f32.mrf.mxu0 }
  0xd7   :  { %v1074_v29 = vadd.f32 %v317_v12, %v289_v28 }
  0xd9   :  { %v327_v31 = vmax.f32 %v1070_v24, %v1074_v29  ;;  %v419_v32 = vpop.f32.mrf.mxu3 }
  0xda   :  { %v420_v44 = vadd.f32 %v419_v32, %v391_v27 }
  0xdc   :  { %v437_v49 = vmax.f32 %v322_v61, %v420_v44 }
  0xdd   :  { %v394_v33 = vpop.f32.mrf.mxu1 }
  0xde   :  { %v291_v34 = vpop.f32.mrf.mxu2  ;;  %v504_v35 = vpop.f32.mrf.mxu0 }
  0xe1   :  { %v422_v36 = vpop.f32.mrf.mxu3 }
  0xe2   :  { %v423_v54 = vadd.f32 %v422_v36, %v394_v33 }
  0xe4   :  { %v438_v61 = vmax.f32 %v323_v4, %v423_v54 }
  0xe5   :  { %v396_v37 = vpop.f32.mrf.mxu1 }
  0xe6   :  { %v532_v38 = vpop.f32.mrf.mxu2  ;;  %v506_v40 = vpop.f32.mrf.mxu0 }
  0xe7   :  { %v533_v41 = vadd.f32 %v532_v38, %v504_v35 }
  0xe9   :  { %v424_v42 = vpop.f32.mrf.mxu3  ;;  %v551_v46 = vmax.f32 %v436_v43, %v533_v41 }
  0xea   :  { %v425_v5 = vadd.f32 %v424_v42, %v396_v37 }
  0xeb   :  { %v562_v52 = vadd.f32 %v792_v47, %v551_v46 }
  0xec   :  { %v439_v9 = vmax.f32 %v324_v11, %v425_v5 }
  0xed   :  { %v399_v45 = vpop.f32.mrf.mxu1  ;;  %v569_v58 = vmax.f32 %v562_v52, 0.0 }
  0xee   :  { %v534_v48 = vpop.f32.mrf.mxu2  ;;  %v509_v51 = vpop.f32.mrf.mxu0 }
  0xef   :  { %v535_v50 = vadd.f32 %v534_v48, %v506_v40 }
  0xf1   :  { %v552_v53 = vmax.f32 %v437_v49, %v535_v50  ;;  %v427_v55 = vpop.f32.mrf.mxu3 }
  0xf2   :  { %v428_v28 = vadd.f32 %v427_v55, %v399_v45 }
  0xf3   :  { %v563_v56 = vadd.f32 %v792_v47, %v552_v53 }
  0xf4   :  { %v440_v4 = vmax.f32 %v325_v18, %v428_v28 }
  0xf5   :  { %v401_v57 = vpop.f32.mrf.mxu1  ;;  %v570_v59 = vmax.f32 %v563_v56, 0.0 }
  0xf6   :  { %v537_v62 = vpop.f32.mrf.mxu2  ;;  %v511_v0 = vpop.f32.mrf.mxu0 }
  0xf7   :  { %v778_v63 = vpack.c.bf16 %v570_v59, %v569_v58  ;;  %v538_v2 = vadd.f32 %v537_v62, %v509_v51 }
  0xf9   :  { %779 = vst [vmem:[%s1111_s6] sm:$0xff] %v778_v63   ;;  %v429_v3 = vpop.f32.mrf.mxu3  ;;  %v553_v7 = vmax.f32 %v438_v61, %v538_v2 }
  0xfa   :  { %v430_v11 = vadd.f32 %v429_v3, %v401_v57 }
  0xfb   :  { %v564_v14 = vadd.f32 %v792_v47, %v553_v7 }
  0xfc   :  { %v441_v35 = vmax.f32 %v326_v25, %v430_v11 }
  0xfd   :  { %v404_v6 = vpop.f32.mrf.mxu1  ;;  %v571_v23 = vmax.f32 %v564_v14, 0.0 }
  0xfe   :  { %v539_v8 = vpop.f32.mrf.mxu2  ;;  %v514_v13 = vpop.f32.mrf.mxu0 }
  0xff   :  { %v540_v12 = vadd.f32 %v539_v8, %v511_v0 }
 0x101   :  { %v554_v16 = vmax.f32 %v439_v9, %v540_v12  ;;  %v432_v19 = vpop.f32.mrf.mxu3 }
 0x102   :  { %v433_v40 = vadd.f32 %v432_v19, %v404_v6 }
 0x103   :  { %v565_v20 = vadd.f32 %v792_v47, %v554_v16 }
 0x104   :  { %v442_v10 = vmax.f32 %v327_v31, %v433_v40 }
 0x105   :  { %v406_v21 = vpop.f32.mrf.mxu1  ;;  %v572_v26 = vmax.f32 %v565_v20, 0.0 }
 0x106   :  { %v542_v27 = vpop.f32.mrf.mxu2  ;;  %v516_v32 = vpop.f32.mrf.mxu0 }
 0x107   :  { %v783_v30 = vpack.c.bf16 %v572_v26, %v571_v23  ;;  %v543_v60 = vadd.f32 %v542_v27, %v514_v13 }
 0x109   :  { %790 = vst [vmem:[%s1111_s6 + $0x8] sm:$0xff] %v783_v30   ;;  %v434_v1 = vpop.f32.mrf.mxu3  ;;  %v555_v33 = vmax.f32 %v440_v4, %v543_v60 }
 0x10b   :  { %v566_v38 = vadd.f32 %v792_v47, %v555_v33 }
 0x10d   :  { %v573_v42 = vmax.f32 %v566_v38, 0.0 }
 0x10e   :  { %v544_v34 = vpop.f32.mrf.mxu2  ;;  %v519_v37 = vpop.f32.mrf.mxu0 }
 0x10f   :  { %v545_v36 = vadd.f32 %v544_v34, %v516_v32 }
 0x111   :  { %v556_v39 = vmax.f32 %v441_v35, %v545_v36 }
 0x113   :  { %v567_v41 = vadd.f32 %v792_v47, %v556_v39 }
 0x115   :  { %v574_v43 = vmax.f32 %v567_v41, 0.0 }
 0x116   :  { %v547_v44 = vpop.f32.mrf.mxu2  ;;  %v521_v45 = vpop.f32.mrf.mxu0 }
 0x117   :  { %v788_v15 = vpack.c.bf16 %v574_v43, %v573_v42  ;;  %v548_v18 = vadd.f32 %v547_v44, %v519_v37 }
 0x119   :  { %791 = vst [vmem:[%s1111_s6 + $0x10] sm:$0xff] %v788_v15   ;;  %v557_v17 = vmax.f32 %v442_v10, %v548_v18 }
 0x11b   :  { %v568_v22 = vadd.f32 %v792_v47, %v557_v17 }
 0x11d   :  { %v575_v25 = vmax.f32 %v568_v22, 0.0 }
 0x11e   :  { %v549_v46 = vpop.f32.mrf.mxu2 }
 0x11f   :  { %v582_v48 = vpack.c.bf16 %v575_v25, %v575_v25 }
 0x121   :  { %589 = vst [vmem:[%s1111_s6 + $0x18] sm:$0x1] %v582_v48 }

// kernel: lenet_dfa_forward.5
= control target key start
LH: loop header
LB: loop body
LE: loop exit
PB: predicated region body
PF: predicated region fallthrough
CT: control target
= control target key end

     0   :  { %s895_s0 = inlined_call_operand.vmem [shape: bf16[2,400], index: 0, kind: input, shape index: {}]   ;;  %s896_s1 = inlined_call_operand.vmem [shape: bf16[400,128], index: 1, kind: input, shape index: {}]   ;;  %s897_s2 = inlined_call_operand.vmem [shape: f32[1,128], index: 2, kind: input, shape index: {}]   ;;  %s898_s3 = inlined_call_operand.vmem [shape: bf16[128,128], index: 3, kind: input, shape index: {}]   ;;  %s899_s4 = inlined_call_operand.vmem [shape: f32[1,128], index: 4, kind: input, shape index: {}]   ;;  %s900_s5 = inlined_call_operand.vmem [shape: bf16[128,128], index: 5, kind: input, shape index: {}]   ;;  %s901_s6 = inlined_call_operand.vmem [shape: f32[1,128], index: 6, kind: input, shape index: {}]   ;;  %s902_s7 = inlined_call_operand.hbm [shape: f32[2,128], index: 7, kind: output, shape index: {}]  }
   0x1   :  { %v652_v0 = vld [vmem:[%s896_s1 + $0x38] sm:$0xff]  ;;  %v651_v3 = vld [vmem:[%s896_s1 + $0x30] sm:$0xff]  ;;  %v650_v6 = vld [vmem:[%s896_s1 + $0x28] sm:$0xff] }
   0x2   :  { %v660_v1 = vld [vmem:[%s896_s1 + $0x78] sm:$0xff]  ;;  %245 = vmatpush.bf16.msra.mxu0 %v652_v0  ;;  %v659_v4 = vld [vmem:[%s896_s1 + $0x70] sm:$0xff]  ;;  %v658_v7 = vld [vmem:[%s896_s1 + $0x68] sm:$0xff] }
   0x3   :  { %v668_v2 = vld [vmem:[%s896_s1 + $0xb8] sm:$0xff]  ;;  %258 = vmatpush.bf16.msra.mxu1 %v660_v1  ;;  %v667_v5 = vld [vmem:[%s896_s1 + $0xb0] sm:$0xff]  ;;  %v669_v8 = vld [vmem:[%s896_s1 + $0xc0] sm:$0xff] }
   0x4   :  { %271 = vmatpush.bf16.msra.mxu2 %v668_v2  ;;  %v666_v9 = vld [vmem:[%s896_s1 + $0xa8] sm:$0xff]  ;;  %v28_v10 = vld [vmem:[%s895_s0] sm:$0xf]  ;;  %291 = vmatpush.bf16.msra.mxu3 %v669_v8  ;;  %v677_v11 = vld [vmem:[%s898_s3 + $0x38] sm:$0xff] }
   0x5   :  { %84 = vst [vmem:[#allocation1] ss:$9 sm:$0xff] %v28_v10  ;;  %v649_v12 = vld [vmem:[%s896_s1 + $0x20] sm:$0xff]  ;;  %v676_v15 = vld [vmem:[%s898_s3 + $0x30] sm:$0xff] }
   0x6   :  { %246 = vmatpush.bf16.msra.mxu0 %v651_v3  ;;  %v657_v13 = vld [vmem:[%s896_s1 + $0x60] sm:$0xff] }
   0x7   :  { %259 = vmatpush.bf16.msra.mxu1 %v659_v4  ;;  %v665_v14 = vld [vmem:[%s896_s1 + $0xa0] sm:$0xff] }
   0x8   :  { %272 = vmatpush.bf16.msra.mxu2 %v667_v5  ;;  %367 = vmatpush.bf16.msrb.mxu3 %v677_v11 }
   0xa   :  { %247 = vmatpush.bf16.msra.mxu0 %v650_v6 }
   0xb   :  { %260 = vmatpush.bf16.msra.mxu1 %v658_v7 }
   0xc   :  { %273 = vmatpush.bf16.msra.mxu2 %v666_v9 }
   0xd   :  { %12 = vsyncpa [#allocation3], 0  ;;  %vm242_vm0 = vcmask 130048   ;;  %v648_v16 = vld [vmem:[%s896_s1 + $0x18] sm:$0xff]  ;;  %368 = vmatpush.bf16.msrb.mxu3 %v676_v15  ;;  %v675_v20 = vld [vmem:[%s898_s3 + $0x28] sm:$0xff]  ;;  %s716_s16 = smov [#allocation2]  }
   0xe   :  { %248 = vmatpush.bf16.msra.mxu0 %v649_v12  ;;  %v656_v17 = vld [vmem:[%s896_s1 + $0x58] sm:$0xff]  ;;  %v647_v21 = vld [vmem:[%s896_s1 + $0x10] sm:$0xff]  ;;  %v674_v24 = vld [vmem:[%s898_s3 + $0x20] sm:$0xff] }
   0xf   :  { %261 = vmatpush.bf16.msra.mxu1 %v657_v13  ;;  %v664_v18 = vld [vmem:[%s896_s1 + $0x98] sm:$0xff]  ;;  %v655_v22 = vld [vmem:[%s896_s1 + $0x50] sm:$0xff]  ;;  %v646_v25 = vld [vmem:[%s896_s1 + $0x8] sm:$0xff] }
  0x10   :  { %274 = vmatpush.bf16.msra.mxu2 %v665_v14  ;;  %v88_v19 = vld [vmem:[#allocation1 + $0x1b] sm:$0xff]  ;;  %v663_v23 = vld [vmem:[%s896_s1 + $0x90] sm:$0xff]  ;;  %v654_v26 = vld [vmem:[%s896_s1 + $0x48] sm:$0xff] }
  0x11   :  { %580 = vmatmul.msk.bf16.vlgmr.msra.gmra.mxu3 %vm242_vm0, %v88_v19  ;;  %v662_v27 = vld [vmem:[%s896_s1 + $0x88] sm:$0xff]  ;;  %v645_v28 = vld [vmem:[%s896_s1] sm:$0xff]  ;;  %v87_v33 = vld [vmem:[#allocation1 + $0x12] sm:$0xff] }
  0x12   :  { %249 = vmatpush.bf16.msra.mxu0 %v648_v16  ;;  %369 = vmatpush.bf16.msrb.mxu3 %v675_v20  ;;  %v653_v29 = vld [vmem:[%s896_s1 + $0x40] sm:$0xff]  ;;  %v86_v32 = vld [vmem:[#allocation1 + $0x9] sm:$0xff]  ;;  %v673_v34 = vld [vmem:[%s898_s3 + $0x18] sm:$0xff] }
  0x13   :  { %262 = vmatpush.bf16.msra.mxu1 %v656_v17  ;;  %v661_v30 = vld [vmem:[%s896_s1 + $0x80] sm:$0xff]  ;;  %v672_v35 = vld [vmem:[%s898_s3 + $0x10] sm:$0xff]  ;;  %v671_v36 = vld [vmem:[%s898_s3 + $0x8] sm:$0xff]  ;;  %s469_s1 = sshll.u32 %s716_s16, 4  ;;  %s470_s1 = int_to_ptr.vmem [resolvable:$true] %s469_s1 }
  0x14   :  { %275 = vmatpush.bf16.msra.mxu2 %v664_v18  ;;  %v85_v31 = vld [vmem:[#allocation1] sm:$0xff]  ;;  %v685_v38 = vld [vmem:[%s900_s5 + $0x38] sm:$0xff]  ;;  %v684_v39 = vld [vmem:[%s900_s5 + $0x30] sm:$0xff] }
  0x15   :  { %v670_v37 = vld [vmem:[%s898_s3] sm:$0xff]  ;;  %v683_v41 = vld [vmem:[%s900_s5 + $0x28] sm:$0xff]  ;;  %v681_v45 = vld [vmem:[%s900_s5 + $0x18] sm:$0xff] }
  0x16   :  { %250 = vmatpush.bf16.msra.mxu0 %v647_v21  ;;  %370 = vmatpush.bf16.msrb.mxu3 %v674_v24  ;;  %v682_v42 = vld [vmem:[%s900_s5 + $0x20] sm:$0xff]  ;;  %v680_v49 = vld [vmem:[%s900_s5 + $0x10] sm:$0xff]  ;;  %v679_v59 = vld [vmem:[%s900_s5 + $0x8] sm:$0xff] }
  0x17   :  { %263 = vmatpush.bf16.msra.mxu1 %v655_v22  ;;  %v687_v43 = vld [vmem:[%s897_s2] ss:$0 sm:$0xff] }
  0x18   :  { %276 = vmatpush.bf16.msra.mxu2 %v663_v23  ;;  %v678_v60 = vld [vmem:[%s900_s5] sm:$0xff]  ;;  %s471_s5 = sshll.u32 %s902_s7, 4  ;;  %s472_s5 = int_to_ptr.hbm [resolvable:$true] %s471_s5 }
  0x19   :  { %v688_v61 = vld [vmem:[%s899_s4] ss:$0 sm:$0xff] }
  0x1a   :  { %251 = vmatpush.bf16.msra.mxu0 %v646_v25  ;;  %371 = vmatpush.bf16.msrb.mxu3 %v673_v34  ;;  %v689_v3 = vld [vmem:[%s901_s6] ss:$0 sm:$0xff] }
  0x1b   :  { %264 = vmatpush.bf16.msra.mxu1 %v654_v26 }
  0x1c   :  { %277 = vmatpush.bf16.msra.mxu2 %v662_v27 }
  0x1e   :  { %252 = vmatpush.bf16.msra.mxu0 %v645_v28  ;;  %372 = vmatpush.bf16.msrb.mxu3 %v672_v35 }
  0x1f   :  { %265 = vmatpush.bf16.msra.mxu1 %v653_v29 }
  0x20   :  { %278 = vmatpush.bf16.msra.mxu2 %v661_v30 }
  0x21   :  { %253 = vmatmul.bf16.vlgmr.msra.gmra.mxu0 %v85_v31 }
  0x22   :  { %266 = vmatmul.bf16.vlgmr.msra.gmra.mxu1 %v86_v32  ;;  %373 = vmatpush.bf16.msrb.mxu3 %v671_v36 }
  0x23   :  { %279 = vmatmul.bf16.vlgmr.msra.gmra.mxu2 %v87_v33  ;;  %450 = vmatpush.bf16.msrb.mxu0 %v685_v38 }
  0x26   :  { %374 = vmatpush.bf16.msrb.mxu3 %v670_v37 }
  0x27   :  { %451 = vmatpush.bf16.msrb.mxu0 %v684_v39 }
  0x2b   :  { %452 = vmatpush.bf16.msrb.mxu0 %v683_v41 }
  0x2f   :  { %453 = vmatpush.bf16.msrb.mxu0 %v682_v42 }
  0x33   :  { %454 = vmatpush.bf16.msrb.mxu0 %v681_v45 }
  0x37   :  { %455 = vmatpush.bf16.msrb.mxu0 %v680_v49 }
  0x3b   :  { %456 = vmatpush.bf16.msrb.mxu0 %v679_v59 }
  0x3f   :  { %457 = vmatpush.bf16.msrb.mxu0 %v678_v60 }
  0x94   :  { %v293_v40 = vpop.f32.mrf.mxu3 }
  0x9c   :  { %v295_v44 = vpop.f32.mrf.mxu3 }
  0x9e   :  { %v254_v46 = vpop.f32.mrf.mxu0 }
  0x9f   :  { %v267_v47 = vpop.f32.mrf.mxu1  ;;  %v255_v48 = vadd.f32 %v687_v43, %v254_v46 }
  0xa1   :  { %v268_v50 = vadd.f32 %v267_v47, %v255_v48 }
  0xa6   :  { %v280_v51 = vpop.f32.mrf.mxu2  ;;  %v256_v53 = vpop.f32.mrf.mxu0 }
  0xa7   :  { %v281_v52 = vadd.f32 %v280_v51, %v268_v50  ;;  %v269_v54 = vpop.f32.mrf.mxu1 }
  0xa9   :  { %v294_v55 = vadd.f32 %v293_v40, %v281_v52 }
  0xab   :  { %v297_v56 = vmax.f32 %v294_v55, 0.0 }
  0xad   :  { %v298_v57 = vpack.c.bf16 %v297_v56, %v297_v56 }
  0xae   :  { %v282_v58 = vpop.f32.mrf.mxu2 }
  0xaf   :  { %375 = vmatmul.bf16.vlgmr.msrb.gmra.mxu3 %v298_v57 }
 0x132   :  { %v376_v62 = vpop.f32.mrf.mxu3 }
 0x133   :  { %v377_v63 = vadd.f32 %v688_v61, %v376_v62 }
 0x135   :  { %v380_v0 = vmax.f32 %v377_v63, 0.0 }
 0x137   :  { %v381_v1 = vpack.c.bf16 %v380_v0, %v380_v0 }
 0x139   :  { %458 = vmatmul.bf16.vlgmr.msrb.gmra.mxu0 %v381_v1 }
 0x13a   :  { %v378_v2 = vpop.f32.mrf.mxu3 }
 0x1b6   :  { %v459_v4 = vpop.f32.mrf.mxu0 }
 0x1b7   :  { %v460_v5 = vadd.f32 %v689_v3, %v459_v4 }
 0x1b9   :  { %463 = vst [vmem:[#allocation2] sm:$0x3] %v460_v5 }
 0x1ba   :  { %474 = dma.vmem_to_hbm [thread:$0]  %s470_s1, 32, %s472_s5, [#allocation3]  }
 0x1be   :  { %v461_v6 = vpop.f32.mrf.mxu0 }
 0x1bf   :  { %714 = dma.done.wait [#allocation3], 32  }
 0x1c0   :  { %715 = vsyncadd [#allocation3], 4294967264 }
 0x1c1   :  { %479 = vsyncpa [#allocation3], 1 }

</bundles_post_ra>
